<compile_context>
chip_gen: v5e
topology: v5e:2x2
jax: 0.10.0
libtpu: 0.0.40
codegen_flags: <defaults>
</compile_context>

<pallas_src>
import math
import functools

import jax
import jax.numpy as jnp
from jax.experimental import pallas as pl
from jax.experimental.pallas import tpu as pltpu


def _round_up(x, m):
    return (x + m - 1) // m * m


# ----------------------------------------------------------------------------
# Fused kernel
# ----------------------------------------------------------------------------
def _gnn_tower_kernel(flag_ref,                       # SMEM scalar prefetch (1,)
                      t_ref, x_ref, a_ref,
                      wt1_ref, bt1_ref, wt2_ref, bt2_ref,
                      wx1_ref, bx1_ref, wx2_ref, bx2_ref,
                      gwx_ref, gwt_ref, gb_ref, gg_ref, gbe_ref,
                      wo1x_ref, wo1t_ref, bo1_ref, wo2_ref, bo2_ref,
                      o_ref,
                      slab_ref, rbias_ref, obias_ref,
                      *, num_layers, tile_m):
    f32 = jnp.float32
    bf16 = jnp.bfloat16

    p = pl.program_id(0)                              # phase: 0 .. num_layers
    i = pl.program_id(1)                              # row tile
    row0 = pl.multiple_of(i * tile_m, tile_m)
    has_edges = flag_ref[0] != 0                      # mirrors `A.nnz == 0`

    # ---- one-time: mlp_in_t and every h_t-derived row bias ------------------
    @pl.when(jnp.logical_and(p == 0, i == 0))
    def _():
        h_t = jnp.maximum(t_ref[...] * wt1_ref[...] + bt1_ref[...], 0.0)   # (1, ht)
        h_t = jnp.dot(h_t, wt2_ref[...], preferred_element_type=f32) + bt2_ref[...]
        h_t = jnp.maximum(h_t, 0.0)
        # cat([h_aggr, h_t]) @ W  ==  h_aggr @ W_x + (h_t @ W_t + b)  row bias
        for l in range(num_layers):
            rbias_ref[l] = (jnp.dot(h_t, gwt_ref[l], preferred_element_type=f32)
                            + gb_ref[l])
        # h_t segment of the final concat folded into the mlp_out first bias
        obias_ref[...] = (jnp.dot(h_t, wo1t_ref[...], preferred_element_type=f32)
                          + bo1_ref[...])

    # ---- phase 0: mlp_in_X for this row tile -> slab segment 0 --------------
    @pl.when(p == 0)
    def _():
        # TODO(synk): X is one-hot; a row gather of wx1 (labels via scalar
        # prefetch) would remove this K=in_X matmul and the one-hot HBM stream.
        h = (jnp.dot(x_ref[...], wx1_ref[...], preferred_element_type=f32)
             + bx1_ref[...])
        h = jnp.maximum(h, 0.0)
        h = (jnp.dot(h.astype(bf16), wx2_ref[...], preferred_element_type=f32)
             + bx2_ref[...])
        h = jnp.maximum(h, 0.0)
        slab_ref[0, pl.ds(row0, tile_m), :] = h.astype(bf16)

    # ---- phases 1..L: GNN layer l for this row tile -> slab segment l -------
    for l in range(1, num_layers + 1):
        @pl.when(p == l)
        def _(l=l):
            h_prev = slab_ref[l - 1]                           # (N_pad, hX) bf16
            agg = jnp.dot(a_ref[...], h_prev, preferred_element_type=f32)
            # `A.nnz == 0` branch as a branch-free select: the common
            # (has-edges) path never round-trips through a VMEM scratch.
            h_self = slab_ref[l - 1, pl.ds(row0, tile_m), :].astype(f32)
            agg = jnp.where(has_edges, agg, h_self)
            y = (jnp.dot(agg.astype(bf16), gwx_ref[l - 1],
                         preferred_element_type=f32)
                 + rbias_ref[l - 1])
            y = jnp.maximum(y, 0.0)
            # LayerNorm (Dropout = identity at inference); math kept in f32
            mean = jnp.mean(y, axis=-1, keepdims=True)
            var = jnp.mean(jnp.square(y - mean), axis=-1, keepdims=True)
            y = (y - mean) * jax.lax.rsqrt(var + 1e-5) * gg_ref[l - 1] + gbe_ref[l - 1]
            slab_ref[l, pl.ds(row0, tile_m), :] = y.astype(bf16)

    # ---- last phase: mlp_out for this row tile -------------------------------
    @pl.when(p == num_layers)
    def _():
        parts = [slab_ref[l, pl.ds(row0, tile_m), :] for l in range(num_layers + 1)]
        hx_cat = parts[0] if len(parts) == 1 else jnp.concatenate(parts, axis=-1)
        # single K=(L+1)*hX matmul replaces the per-layer K=hX accumulations
        acc = jnp.dot(hx_cat, wo1x_ref[...], preferred_element_type=f32)
        h1 = jnp.maximum(acc + obias_ref[...], 0.0)            # (tile_m, hc_pad)
        o_ref[...] = (jnp.dot(h1.astype(bf16), wo2_ref[...],
                              preferred_element_type=f32)
                      + bo2_ref[...])


# ----------------------------------------------------------------------------
# pallas_call wrapper (single fused call, fully jittable)
# ----------------------------------------------------------------------------
def gnn_tower_forward(params, t_float, X_t_one_hot, A_t, *,
                      block_rows=512, has_edges=None):
    f32, bf16 = jnp.float32, jnp.bfloat16

    N, in_X = X_t_one_hot.shape
    hidden_t = params["wt1"].shape[1]
    hidden_X = params["wx1"].shape[1]
    num_layers = int(params["gwx"].shape[0])
    out_size = params["wo2"].shape[1]
    hidden_cat = (num_layers + 1) * hidden_X + hidden_t
    assert params["wo1"].shape == (hidden_cat, hidden_cat)
    assert hidden_X % 8 == 0, "hidden_X must be a multiple of 8 (sublane aligned)"

    slab_w = (num_layers + 1) * hidden_X
    hc_pad = _round_up(hidden_cat, 128)               # lane-dense mlp_out hidden
    out_pad = _round_up(out_size, 128)                # lane-dense output slab

    # ---- row tiling / padding ------------------------------------------------
    tile_m = max(16, min(_round_up(block_rows, 16), _round_up(N, 16)))
    N_pad = _round_up(N, tile_m)
    num_tiles = N_pad // tile_m
    num_phases = num_layers + 1

    # ---- operand preparation: bf16 MXU operands, zero padding ----------------
    Xp = jnp.pad(X_t_one_hot.astype(bf16), ((0, N_pad - N), (0, 0)))
    Ap = jnp.pad(A_t, ((0, N_pad - N), (0, N_pad - N))).astype(bf16)  # 0/1 exact

    if has_edges is None:
        has_edges = jnp.any(A_t != 0)                 # on-device; no host sync
    flag = jnp.asarray(has_edges, jnp.int32).reshape(1)
    t2 = jnp.asarray(t_float, f32).reshape(1, 1)

    pad_c = hc_pad - hidden_cat
    wo1 = jnp.pad(params["wo1"].astype(f32), ((0, 0), (0, pad_c)))
    wo1x = wo1[:slab_w].astype(bf16)                  # (slab_w, hc_pad)  bf16
    wo1t = wo1[slab_w:]                               # (ht, hc_pad)      f32
    bo1p = jnp.pad(params["bo1"].astype(f32), ((0, 0), (0, pad_c)))
    wo2p = jnp.pad(params["wo2"].astype(f32),
                   ((0, pad_c), (0, out_pad - out_size))).astype(bf16)
    bo2p = jnp.pad(params["bo2"].astype(f32), ((0, 0), (0, out_pad - out_size)))

    ordered_inputs = (
        t2, Xp, Ap,
        params["wt1"].astype(f32), params["bt1"].astype(f32),
        params["wt2"].astype(f32), params["bt2"].astype(f32),
        params["wx1"].astype(bf16), params["bx1"].astype(f32),
        params["wx2"].astype(bf16), params["bx2"].astype(f32),
        params["gwx"].astype(bf16), params["gwt"].astype(f32),
        params["gb"].astype(f32), params["ggamma"].astype(f32),
        params["gbeta"].astype(f32),
        wo1x, wo1t, bo1p, wo2p, bo2p,
    )

    def _full(shape):
        nd = len(shape)
        return pl.BlockSpec(shape, lambda p, i, flag, nd=nd: (0,) * nd)

    in_specs = [
        _full(t2.shape),                                            # t scalar
        pl.BlockSpec((tile_m, in_X), lambda p, i, flag: (i, 0)),    # X row tile
        # A row tile (default double buffering; pl.Buffered(3) would hide DMA
        # jitter at more VMEM).  Pinned to tile 0 during phase 0 so A is
        # streamed exactly once per GNN layer.
        pl.BlockSpec((tile_m, N_pad),
                     lambda p, i, flag: (i * jnp.minimum(p, 1), 0)),
    ] + [_full(a.shape) for a in ordered_inputs[3:]]

    # output blocks are only produced in the last phase; gate the index map so
    # nothing is written back to HBM before then.
    out_spec = pl.BlockSpec(
        (tile_m, out_pad),
        lambda p, i, flag: (i * jnp.maximum(p - (num_layers - 1), 0), 0))

    weight_bytes = sum(int(a.size) * a.dtype.itemsize for a in ordered_inputs[3:])
    vmem_need = (2 * tile_m * N_pad * 2                      # A tiles (bf16, x2 buf)
                 + 2 * tile_m * in_X * 2                     # X tiles
                 + 2 * tile_m * out_pad * 4                  # output tiles (f32)
                 + (num_layers + 1) * N_pad * hidden_X * 2   # h_X slab scratch
                 + weight_bytes
                 + (4 << 20))                                # temporaries/headroom
    vmem_limit = int(min(max(vmem_need, 32 << 20), 56 << 20))

    kernel = functools.partial(_gnn_tower_kernel,
                               num_layers=num_layers, tile_m=tile_m)

    out = pl.pallas_call(
        kernel,
        out_shape=jax.ShapeDtypeStruct((N_pad, out_pad), f32),
        grid_spec=pltpu.PrefetchScalarGridSpec(
            num_scalar_prefetch=1,
            grid=(num_phases, num_tiles),
            in_specs=in_specs,
            out_specs=out_spec,
            scratch_shapes=[
                pltpu.VMEM((num_layers + 1, N_pad, hidden_X), bf16),  # h_X slab
                pltpu.VMEM((max(num_layers, 1), 1, hidden_X), f32),   # layer h_t bias
                pltpu.VMEM((1, hc_pad), f32),                         # mlp_out h_t bias
            ],
        ),
        # TODO(synk): the row-tile axis cannot be "parallel" while the h_X slab
        # lives in per-core scratch (layer l+1 needs every core's rows); on v7x,
        # split phases into per-phase calls (h_X via HBM) to use both TCs.
        compiler_params=pltpu.CompilerParams(
            dimension_semantics=("arbitrary", "arbitrary"),
            vmem_limit_bytes=vmem_limit),
    )(flag, *ordered_inputs)

    return out[:N, :out_size]


# ----------------------------------------------------------------------------
# Deterministic parameter init (PyTorch nn.Linear default U(-1/sqrt(fan_in),.))
# Weights stored transposed vs PyTorch: W is (in, out) so y = x @ W + b.
# ----------------------------------------------------------------------------
def linear_params(key, fan_in, fan_out):
    kw, kb = jax.random.split(key)
    bound = 1.0 / math.sqrt(fan_in)
    w = jax.random.uniform(kw, (fan_in, fan_out), jnp.float32, -bound, bound)
    b = jax.random.uniform(kb, (1, fan_out), jnp.float32, -bound, bound)
    return w, b


def init_params(key, in_X, hidden_t, hidden_X, out_size, num_gnn_layers):
    keys = jax.random.split(key, 6 + num_gnn_layers)
    p = {}
    p["wt1"], p["bt1"] = linear_params(keys[0], 1, hidden_t)
    p["wt2"], p["bt2"] = linear_params(keys[1], hidden_t, hidden_t)
    p["wx1"], p["bx1"] = linear_params(keys[2], in_X, hidden_X)
    p["wx2"], p["bx2"] = linear_params(keys[3], hidden_X, hidden_X)

    gwx, gwt, gb, gg, gbe = [], [], [], [], []
    for l in range(num_gnn_layers):
        w, b = linear_params(keys[4 + l], hidden_X + hidden_t, hidden_X)
        # split W rows by concat order [h_aggr_X (hX rows) | h_t (ht rows)]
        gwx.append(w[:hidden_X])
        gwt.append(w[hidden_X:])
        gb.append(b)
        gg.append(jnp.ones((1, hidden_X), jnp.float32))
        gbe.append(jnp.zeros((1, hidden_X), jnp.float32))
    p["gwx"] = jnp.stack(gwx)        # (L, hX, hX)
    p["gwt"] = jnp.stack(gwt)        # (L, ht, hX)
    p["gb"] = jnp.stack(gb)          # (L, 1,  hX)
    p["ggamma"] = jnp.stack(gg)      # (L, 1,  hX)
    p["gbeta"] = jnp.stack(gbe)      # (L, 1,  hX)

    hidden_cat = (num_gnn_layers + 1) * hidden_X + hidden_t
    k = 4 + num_gnn_layers
    p["wo1"], p["bo1"] = linear_params(keys[k], hidden_cat, hidden_cat)
    p["wo2"], p["bo2"] = linear_params(keys[k + 1], hidden_cat, out_size)
    return p


# ----------------------------------------------------------------------------
# Pure-JAX f32 reference (mirrors the PyTorch module) for a tolerance check
# ----------------------------------------------------------------------------
def gnn_tower_reference(params, t_float, X, A):
    relu = jax.nn.relu
    h_t = relu(t_float.reshape(1, 1) @ params["wt1"] + params["bt1"])
    h_t = relu(h_t @ params["wt2"] + params["bt2"])
    h = relu(X @ params["wx1"] + params["bx1"])
    h = relu(h @ params["wx2"] + params["bx2"])
    hs = [h]
    has_edges = bool(jnp.any(A != 0))
    n = X.shape[0]
    for l in range(params["gwx"].shape[0]):
        agg = A @ h if has_edges else h
        w = jnp.concatenate([params["gwx"][l], params["gwt"][l]], axis=0)
        cat = jnp.concatenate([agg, jnp.broadcast_to(h_t, (n, h_t.shape[1]))], axis=1)
        y = relu(cat @ w + params["gb"][l])
        mean = y.mean(-1, keepdims=True)
        var = jnp.square(y - mean).mean(-1, keepdims=True)
        h = (y - mean) / jnp.sqrt(var + 1e-5) * params["ggamma"][l] + params["gbeta"][l]
        hs.append(h)
    hcat = jnp.concatenate(hs + [jnp.broadcast_to(h_t, (n, h_t.shape[1]))], axis=1)
    return relu(hcat @ params["wo1"] + params["bo1"]) @ params["wo2"] + params["bo2"]


# ----------------------------------------------------------------------------
# Demo
# ----------------------------------------------------------------------------
if __name__ == "__main__":
    in_X, out_size = 8, 32
    hidden_t, hidden_X = 16, 32
    num_gnn_layers = 2
    N = 16

    key = jax.random.PRNGKey(0)
    kp, kx, ka = jax.random.split(key, 3)

    params = init_params(kp, in_X, hidden_t, hidden_X, out_size, num_gnn_layers)

    t_float = jnp.array([0.5], dtype=jnp.float32)                        # (1,)
    labels = jax.random.randint(kx, (N,), 0, in_X)
    X_t_one_hot = jax.nn.one_hot(labels, in_X, dtype=jnp.float32)        # (N, in_X)
    A_t = (jax.random.uniform(ka, (N, N)) < 0.2).astype(jnp.float32)     # dense adj

    fwd = jax.jit(gnn_tower_forward)
    out = fwd(params, t_float, X_t_one_hot, A_t)
    jax.block_until_ready(out)

    ref = gnn_tower_reference(params, t_float, X_t_one_hot, A_t)
    assert out.shape == (N, out_size)
    assert bool(jnp.all(jnp.isfinite(out)))
    # bf16 MXU operands -> generous but bug-catching tolerance vs f32 reference
    rel_err = float(jnp.linalg.norm(out - ref) / jnp.linalg.norm(ref))
    assert rel_err < 0.2, rel_err
    print("KERNEL_OK")
</pallas_src>

<mosaic_0001>
module attributes {stable_mosaic.version = 11 : i64} {
  func.func @_gnn_tower_kernel(%arg0: i32, %arg1: i32, %arg2: memref<1xi32, #tpu.memory_space<smem>>, %arg3: memref<1x1xf32, #tpu.memory_space<vmem>>, %arg4: memref<16x8xbf16, #tpu.memory_space<vmem>>, %arg5: memref<16x16xbf16, #tpu.memory_space<vmem>>, %arg6: memref<1x16xf32, #tpu.memory_space<vmem>>, %arg7: memref<1x16xf32, #tpu.memory_space<vmem>>, %arg8: memref<16x16xf32, #tpu.memory_space<vmem>>, %arg9: memref<1x16xf32, #tpu.memory_space<vmem>>, %arg10: memref<8x32xbf16, #tpu.memory_space<vmem>>, %arg11: memref<1x32xf32, #tpu.memory_space<vmem>>, %arg12: memref<32x32xbf16, #tpu.memory_space<vmem>>, %arg13: memref<1x32xf32, #tpu.memory_space<vmem>>, %arg14: memref<2x32x32xbf16, #tpu.memory_space<vmem>>, %arg15: memref<2x16x32xf32, #tpu.memory_space<vmem>>, %arg16: memref<2x1x32xf32, #tpu.memory_space<vmem>>, %arg17: memref<2x1x32xf32, #tpu.memory_space<vmem>>, %arg18: memref<2x1x32xf32, #tpu.memory_space<vmem>>, %arg19: memref<96x128xbf16, #tpu.memory_space<vmem>>, %arg20: memref<16x128xf32, #tpu.memory_space<vmem>>, %arg21: memref<1x128xf32, #tpu.memory_space<vmem>>, %arg22: memref<128x128xbf16, #tpu.memory_space<vmem>>, %arg23: memref<1x128xf32, #tpu.memory_space<vmem>>, %arg24: memref<16x128xf32, #tpu.memory_space<vmem>>, %arg25: memref<3x16x32xbf16, #tpu.memory_space<vmem>>, %arg26: memref<2x1x32xf32, #tpu.memory_space<vmem>>, %arg27: memref<1x128xf32, #tpu.memory_space<vmem>>) attributes {dimension_semantics = [#tpu.dimension_semantics<arbitrary>, #tpu.dimension_semantics<arbitrary>], iteration_bounds = array<i64: 3, 1>, scalar_prefetch = 1 : i64, scratch_operands = 3 : i64, tpu.core_type = #tpu.core_type<tc>, window_params = [{pipeline_mode = #tpu.pipeline_mode<synchronous>, transform_indices = @transform_0, window_bounds = array<i64: 1, 1>}, {transform_indices = @transform_1, window_bounds = array<i64: 16, 8>}, {transform_indices = @transform_2, window_bounds = array<i64: 16, 16>}, {pipeline_mode = #tpu.pipeline_mode<synchronous>, transform_indices = @transform_3, window_bounds = array<i64: 1, 16>}, {pipeline_mode = #tpu.pipeline_mode<synchronous>, transform_indices = @transform_4, window_bounds = array<i64: 1, 16>}, {pipeline_mode = #tpu.pipeline_mode<synchronous>, transform_indices = @transform_5, window_bounds = array<i64: 16, 16>}, {pipeline_mode = #tpu.pipeline_mode<synchronous>, transform_indices = @transform_6, window_bounds = array<i64: 1, 16>}, {pipeline_mode = #tpu.pipeline_mode<synchronous>, transform_indices = @transform_7, window_bounds = array<i64: 8, 32>}, {pipeline_mode = #tpu.pipeline_mode<synchronous>, transform_indices = @transform_8, window_bounds = array<i64: 1, 32>}, {pipeline_mode = #tpu.pipeline_mode<synchronous>, transform_indices = @transform_9, window_bounds = array<i64: 32, 32>}, {pipeline_mode = #tpu.pipeline_mode<synchronous>, transform_indices = @transform_10, window_bounds = array<i64: 1, 32>}, {pipeline_mode = #tpu.pipeline_mode<synchronous>, transform_indices = @transform_11, window_bounds = array<i64: 2, 32, 32>}, {pipeline_mode = #tpu.pipeline_mode<synchronous>, transform_indices = @transform_12, window_bounds = array<i64: 2, 16, 32>}, {pipeline_mode = #tpu.pipeline_mode<synchronous>, transform_indices = @transform_13, window_bounds = array<i64: 2, 1, 32>}, {pipeline_mode = #tpu.pipeline_mode<synchronous>, transform_indices = @transform_14, window_bounds = array<i64: 2, 1, 32>}, {pipeline_mode = #tpu.pipeline_mode<synchronous>, transform_indices = @transform_15, window_bounds = array<i64: 2, 1, 32>}, {pipeline_mode = #tpu.pipeline_mode<synchronous>, transform_indices = @transform_16, window_bounds = array<i64: 96, 128>}, {pipeline_mode = #tpu.pipeline_mode<synchronous>, transform_indices = @transform_17, window_bounds = array<i64: 16, 128>}, {pipeline_mode = #tpu.pipeline_mode<synchronous>, transform_indices = @transform_18, window_bounds = array<i64: 1, 128>}, {pipeline_mode = #tpu.pipeline_mode<synchronous>, transform_indices = @transform_19, window_bounds = array<i64: 128, 128>}, {pipeline_mode = #tpu.pipeline_mode<synchronous>, transform_indices = @transform_20, window_bounds = array<i64: 1, 128>}, {transform_indices = @transform_21, window_bounds = array<i64: 16, 128>}]} {
    %c16_i32 = arith.constant 16 : i32
    %0 = arith.muli %arg1, %c16_i32 : i32
    %1 = tpu.assume_multiple %0, 16 : i32
    %c0 = arith.constant 0 : index
    %2 = memref.load %arg2[%c0] : memref<1xi32, #tpu.memory_space<smem>>
    %c0_i32 = arith.constant 0 : i32
    %3 = arith.cmpi ne, %2, %c0_i32 : i32
    %c0_i32_0 = arith.constant 0 : i32
    %4 = arith.cmpi eq, %arg0, %c0_i32_0 : i32
    %c0_i32_1 = arith.constant 0 : i32
    %5 = arith.cmpi eq, %arg1, %c0_i32_1 : i32
    %6 = arith.andi %4, %5 : i1
    %7 = arith.extui %6 : i1 to i32
    %c0_i32_2 = arith.constant 0 : i32
    %8 = arith.cmpi ne, %7, %c0_i32_2 : i32
    scf.if %8 {
      %c0_9 = arith.constant 0 : index
      %c0_10 = arith.constant 0 : index
      %21 = vector.load %arg3[%c0_9, %c0_10] : memref<1x1xf32, #tpu.memory_space<vmem>>, vector<1x1xf32>
      %c0_11 = arith.constant 0 : index
      %c0_12 = arith.constant 0 : index
      %22 = vector.load %arg6[%c0_11, %c0_12] : memref<1x16xf32, #tpu.memory_space<vmem>>, vector<1x16xf32>
      %23 = vector.broadcast %21 : vector<1x1xf32> to vector<1x16xf32>
      %24 = arith.mulf %23, %22 : vector<1x16xf32>
      %c0_13 = arith.constant 0 : index
      %c0_14 = arith.constant 0 : index
      %25 = vector.load %arg7[%c0_13, %c0_14] : memref<1x16xf32, #tpu.memory_space<vmem>>, vector<1x16xf32>
      %26 = arith.addf %24, %25 : vector<1x16xf32>
      %cst = arith.constant 0.000000e+00 : f32
      %27 = vector.broadcast %cst : f32 to vector<1x16xf32>
      %28 = arith.maximumf %26, %27 : vector<1x16xf32>
      %c0_15 = arith.constant 0 : index
      %c0_16 = arith.constant 0 : index
      %29 = vector.load %arg8[%c0_15, %c0_16] : memref<16x16xf32, #tpu.memory_space<vmem>>, vector<16x16xf32>
      %cst_17 = arith.constant dense<0.000000e+00> : vector<1x16xf32>
      %30 = tpu.matmul %28, %29, %cst_17 {dimension_numbers = #tpu.dot_dimension_numbers<[1], [0], [0], [1], [0, 0, 1, 1], [], []>} : vector<1x16xf32>, vector<16x16xf32>, vector<1x16xf32> -> vector<1x16xf32>
      %c0_18 = arith.constant 0 : index
      %c0_19 = arith.constant 0 : index
      %31 = vector.load %arg9[%c0_18, %c0_19] : memref<1x16xf32, #tpu.memory_space<vmem>>, vector<1x16xf32>
      %32 = arith.addf %30, %31 : vector<1x16xf32>
      %cst_20 = arith.constant 0.000000e+00 : f32
      %33 = vector.broadcast %cst_20 : f32 to vector<1x16xf32>
      %34 = arith.maximumf %32, %33 : vector<1x16xf32>
      %c0_21 = arith.constant 0 : index
      %c0_22 = arith.constant 0 : index
      %c0_23 = arith.constant 0 : index
      %35 = vector.load %arg15[%c0_21, %c0_22, %c0_23] : memref<2x16x32xf32, #tpu.memory_space<vmem>>, vector<1x16x32xf32>
      %36 = vector.shape_cast %35 : vector<1x16x32xf32> to vector<16x32xf32>
      %cst_24 = arith.constant dense<0.000000e+00> : vector<1x32xf32>
      %37 = tpu.matmul %34, %36, %cst_24 {dimension_numbers = #tpu.dot_dimension_numbers<[1], [0], [0], [1], [0, 0, 1, 1], [], []>} : vector<1x16xf32>, vector<16x32xf32>, vector<1x32xf32> -> vector<1x32xf32>
      %c0_25 = arith.constant 0 : index
      %c0_26 = arith.constant 0 : index
      %c0_27 = arith.constant 0 : index
      %38 = vector.load %arg16[%c0_25, %c0_26, %c0_27] : memref<2x1x32xf32, #tpu.memory_space<vmem>>, vector<1x1x32xf32>
      %39 = vector.shape_cast %38 : vector<1x1x32xf32> to vector<1x32xf32>
      %40 = arith.addf %37, %39 : vector<1x32xf32>
      %c0_28 = arith.constant 0 : index
      %c0_29 = arith.constant 0 : index
      %c0_30 = arith.constant 0 : index
      %41 = vector.load %arg26[%c0_28, %c0_29, %c0_30] : memref<2x1x32xf32, #tpu.memory_space<vmem>>, vector<1x1x32xf32>
      %42 = vector.shape_cast %41 : vector<1x1x32xf32> to vector<1x32xf32>
      %43 = vector.shape_cast %40 : vector<1x32xf32> to vector<1x1x32xf32>
      tpu.vector_store %arg26[%c0_28, %c0_29, %c0_30], %43 {strides = array<i32>} : memref<2x1x32xf32, #tpu.memory_space<vmem>>, vector<1x1x32xf32>,
      %c1 = arith.constant 1 : index
      %c0_31 = arith.constant 0 : index
      %c0_32 = arith.constant 0 : index
      %44 = vector.load %arg15[%c1, %c0_31, %c0_32] : memref<2x16x32xf32, #tpu.memory_space<vmem>>, vector<1x16x32xf32>
      %45 = vector.shape_cast %44 : vector<1x16x32xf32> to vector<16x32xf32>
      %cst_33 = arith.constant dense<0.000000e+00> : vector<1x32xf32>
      %46 = tpu.matmul %34, %45, %cst_33 {dimension_numbers = #tpu.dot_dimension_numbers<[1], [0], [0], [1], [0, 0, 1, 1], [], []>} : vector<1x16xf32>, vector<16x32xf32>, vector<1x32xf32> -> vector<1x32xf32>
      %c1_34 = arith.constant 1 : index
      %c0_35 = arith.constant 0 : index
      %c0_36 = arith.constant 0 : index
      %47 = vector.load %arg16[%c1_34, %c0_35, %c0_36] : memref<2x1x32xf32, #tpu.memory_space<vmem>>, vector<1x1x32xf32>
      %48 = vector.shape_cast %47 : vector<1x1x32xf32> to vector<1x32xf32>
      %49 = arith.addf %46, %48 : vector<1x32xf32>
      %c1_37 = arith.constant 1 : index
      %c0_38 = arith.constant 0 : index
      %c0_39 = arith.constant 0 : index
      %50 = vector.load %arg26[%c1_37, %c0_38, %c0_39] : memref<2x1x32xf32, #tpu.memory_space<vmem>>, vector<1x1x32xf32>
      %51 = vector.shape_cast %50 : vector<1x1x32xf32> to vector<1x32xf32>
      %52 = vector.shape_cast %49 : vector<1x32xf32> to vector<1x1x32xf32>
      tpu.vector_store %arg26[%c1_37, %c0_38, %c0_39], %52 {strides = array<i32>} : memref<2x1x32xf32, #tpu.memory_space<vmem>>, vector<1x1x32xf32>,
      %c0_40 = arith.constant 0 : index
      %c0_41 = arith.constant 0 : index
      %53 = vector.load %arg20[%c0_40, %c0_41] : memref<16x128xf32, #tpu.memory_space<vmem>>, vector<16x128xf32>
      %cst_42 = arith.constant dense<0.000000e+00> : vector<1x128xf32>
      %54 = tpu.matmul %34, %53, %cst_42 {dimension_numbers = #tpu.dot_dimension_numbers<[1], [0], [0], [1], [0, 0, 1, 1], [], []>} : vector<1x16xf32>, vector<16x128xf32>, vector<1x128xf32> -> vector<1x128xf32>
      %c0_43 = arith.constant 0 : index
      %c0_44 = arith.constant 0 : index
      %55 = vector.load %arg21[%c0_43, %c0_44] : memref<1x128xf32, #tpu.memory_space<vmem>>, vector<1x128xf32>
      %56 = arith.addf %54, %55 : vector<1x128xf32>
      %c0_45 = arith.constant 0 : index
      %c0_46 = arith.constant 0 : index
      %57 = vector.load %arg27[%c0_45, %c0_46] : memref<1x128xf32, #tpu.memory_space<vmem>>, vector<1x128xf32>
      tpu.vector_store %arg27[%c0_45, %c0_46], %56 {strides = array<i32>} : memref<1x128xf32, #tpu.memory_space<vmem>>, vector<1x128xf32>,
    } else {
    }
    %c0_i32_3 = arith.constant 0 : i32
    %9 = arith.cmpi eq, %arg0, %c0_i32_3 : i32
    %10 = arith.extui %9 : i1 to i32
    %c0_i32_4 = arith.constant 0 : i32
    %11 = arith.cmpi ne, %10, %c0_i32_4 : i32
    scf.if %11 {
      %c0_9 = arith.constant 0 : index
      %c0_10 = arith.constant 0 : index
      %21 = vector.load %arg4[%c0_9, %c0_10] : memref<16x8xbf16, #tpu.memory_space<vmem>>, vector<16x8xbf16>
      %c0_11 = arith.constant 0 : index
      %c0_12 = arith.constant 0 : index
      %22 = vector.load %arg10[%c0_11, %c0_12] : memref<8x32xbf16, #tpu.memory_space<vmem>>, vector<8x32xbf16>
      %cst = arith.constant dense<0.000000e+00> : vector<16x32xf32>
      %23 = tpu.matmul %21, %22, %cst {dimension_numbers = #tpu.dot_dimension_numbers<[1], [0], [0], [1], [0, 0, 1, 1], [], []>} : vector<16x8xbf16>, vector<8x32xbf16>, vector<16x32xf32> -> vector<16x32xf32>
      %c0_13 = arith.constant 0 : index
      %c0_14 = arith.constant 0 : index
      %24 = vector.load %arg11[%c0_13, %c0_14] : memref<1x32xf32, #tpu.memory_space<vmem>>, vector<1x32xf32>
      %25 = vector.broadcast %24 : vector<1x32xf32> to vector<16x32xf32>
      %26 = arith.addf %23, %25 : vector<16x32xf32>
      %cst_15 = arith.constant 0.000000e+00 : f32
      %27 = vector.broadcast %cst_15 : f32 to vector<16x32xf32>
      %28 = arith.maximumf %26, %27 : vector<16x32xf32>
      %29 = arith.truncf %28 : vector<16x32xf32> to vector<16x32xbf16>
      %c0_16 = arith.constant 0 : index
      %c0_17 = arith.constant 0 : index
      %30 = vector.load %arg12[%c0_16, %c0_17] : memref<32x32xbf16, #tpu.memory_space<vmem>>, vector<32x32xbf16>
      %cst_18 = arith.constant dense<0.000000e+00> : vector<16x32xf32>
      %31 = tpu.matmul %29, %30, %cst_18 {dimension_numbers = #tpu.dot_dimension_numbers<[1], [0], [0], [1], [0, 0, 1, 1], [], []>} : vector<16x32xbf16>, vector<32x32xbf16>, vector<16x32xf32> -> vector<16x32xf32>
      %c0_19 = arith.constant 0 : index
      %c0_20 = arith.constant 0 : index
      %32 = vector.load %arg13[%c0_19, %c0_20] : memref<1x32xf32, #tpu.memory_space<vmem>>, vector<1x32xf32>
      %33 = vector.broadcast %32 : vector<1x32xf32> to vector<16x32xf32>
      %34 = arith.addf %31, %33 : vector<16x32xf32>
      %cst_21 = arith.constant 0.000000e+00 : f32
      %35 = vector.broadcast %cst_21 : f32 to vector<16x32xf32>
      %36 = arith.maximumf %34, %35 : vector<16x32xf32>
      %37 = arith.truncf %36 : vector<16x32xf32> to vector<16x32xbf16>
      %c0_22 = arith.constant 0 : index
      %38 = arith.index_cast %1 : i32 to index
      %c0_23 = arith.constant 0 : index
      %39 = vector.load %arg25[%c0_22, %38, %c0_23] : memref<3x16x32xbf16, #tpu.memory_space<vmem>>, vector<1x16x32xbf16>
      %40 = vector.shape_cast %39 : vector<1x16x32xbf16> to vector<16x32xbf16>
      %41 = vector.shape_cast %37 : vector<16x32xbf16> to vector<1x16x32xbf16>
      tpu.vector_store %arg25[%c0_22, %38, %c0_23], %41 {strides = array<i32>} : memref<3x16x32xbf16, #tpu.memory_space<vmem>>, vector<1x16x32xbf16>,
    } else {
    }
    %c1_i32 = arith.constant 1 : i32
    %12 = arith.cmpi eq, %arg0, %c1_i32 : i32
    %13 = arith.extui %12 : i1 to i32
    %c0_i32_5 = arith.constant 0 : i32
    %14 = arith.cmpi ne, %13, %c0_i32_5 : i32
    scf.if %14 {
      %c0_9 = arith.constant 0 : index
      %c0_10 = arith.constant 0 : index
      %c0_11 = arith.constant 0 : index
      %21 = vector.load %arg25[%c0_9, %c0_10, %c0_11] : memref<3x16x32xbf16, #tpu.memory_space<vmem>>, vector<1x16x32xbf16>
      %22 = vector.shape_cast %21 : vector<1x16x32xbf16> to vector<16x32xbf16>
      %c0_12 = arith.constant 0 : index
      %c0_13 = arith.constant 0 : index
      %23 = vector.load %arg5[%c0_12, %c0_13] : memref<16x16xbf16, #tpu.memory_space<vmem>>, vector<16x16xbf16>
      %cst = arith.constant dense<0.000000e+00> : vector<16x32xf32>
      %24 = tpu.matmul %23, %22, %cst {dimension_numbers = #tpu.dot_dimension_numbers<[1], [0], [0], [1], [0, 0, 1, 1], [], []>} : vector<16x16xbf16>, vector<16x32xbf16>, vector<16x32xf32> -> vector<16x32xf32>
      %c0_14 = arith.constant 0 : index
      %25 = arith.index_cast %1 : i32 to index
      %c0_15 = arith.constant 0 : index
      %26 = vector.load %arg25[%c0_14, %25, %c0_15] : memref<3x16x32xbf16, #tpu.memory_space<vmem>>, vector<1x16x32xbf16>
      %27 = vector.shape_cast %26 : vector<1x16x32xbf16> to vector<16x32xbf16>
      %28 = arith.extf %27 : vector<16x32xbf16> to vector<16x32xf32>
      %29 = arith.select %3, %24, %28 : vector<16x32xf32>
      %30 = arith.truncf %29 : vector<16x32xf32> to vector<16x32xbf16>
      %c0_16 = arith.constant 0 : index
      %c0_17 = arith.constant 0 : index
      %c0_18 = arith.constant 0 : index
      %31 = vector.load %arg14[%c0_16, %c0_17, %c0_18] : memref<2x32x32xbf16, #tpu.memory_space<vmem>>, vector<1x32x32xbf16>
      %32 = vector.shape_cast %31 : vector<1x32x32xbf16> to vector<32x32xbf16>
      %cst_19 = arith.constant dense<0.000000e+00> : vector<16x32xf32>
      %33 = tpu.matmul %30, %32, %cst_19 {dimension_numbers = #tpu.dot_dimension_numbers<[1], [0], [0], [1], [0, 0, 1, 1], [], []>} : vector<16x32xbf16>, vector<32x32xbf16>, vector<16x32xf32> -> vector<16x32xf32>
      %c0_20 = arith.constant 0 : index
      %c0_21 = arith.constant 0 : index
      %c0_22 = arith.constant 0 : index
      %34 = vector.load %arg26[%c0_20, %c0_21, %c0_22] : memref<2x1x32xf32, #tpu.memory_space<vmem>>, vector<1x1x32xf32>
      %35 = vector.shape_cast %34 : vector<1x1x32xf32> to vector<1x32xf32>
      %36 = vector.broadcast %35 : vector<1x32xf32> to vector<16x32xf32>
      %37 = arith.addf %33, %36 : vector<16x32xf32>
      %cst_23 = arith.constant 0.000000e+00 : f32
      %38 = vector.broadcast %cst_23 : f32 to vector<16x32xf32>
      %39 = arith.maximumf %37, %38 : vector<16x32xf32>
      %cst_24 = arith.constant dense<0.000000e+00> : vector<16xf32>
      %40 = vector.multi_reduction <add>, %39, %cst_24 [1] : vector<16x32xf32> to vector<16xf32>
      %41 = vector.shape_cast %40 : vector<16xf32> to vector<16x1xf32>
      %cst_25 = arith.constant 3.200000e+01 : f32
      %42 = vector.broadcast %cst_25 : f32 to vector<16x1xf32>
      %43 = arith.divf %41, %42 : vector<16x1xf32>
      %44 = vector.broadcast %43 : vector<16x1xf32> to vector<16x32xf32>
      %45 = arith.subf %39, %44 : vector<16x32xf32>
      %46 = arith.mulf %45, %45 : vector<16x32xf32>
      %cst_26 = arith.constant dense<0.000000e+00> : vector<16xf32>
      %47 = vector.multi_reduction <add>, %46, %cst_26 [1] : vector<16x32xf32> to vector<16xf32>
      %48 = vector.shape_cast %47 : vector<16xf32> to vector<16x1xf32>
      %cst_27 = arith.constant 3.200000e+01 : f32
      %49 = vector.broadcast %cst_27 : f32 to vector<16x1xf32>
      %50 = arith.divf %48, %49 : vector<16x1xf32>
      %51 = vector.broadcast %43 : vector<16x1xf32> to vector<16x32xf32>
      %52 = arith.subf %39, %51 : vector<16x32xf32>
      %cst_28 = arith.constant 9.99999974E-6 : f32
      %53 = vector.broadcast %cst_28 : f32 to vector<16x1xf32>
      %54 = arith.addf %50, %53 : vector<16x1xf32>
      %55 = math.rsqrt %54 : vector<16x1xf32>
      %56 = vector.broadcast %55 : vector<16x1xf32> to vector<16x32xf32>
      %57 = arith.mulf %52, %56 : vector<16x32xf32>
      %c0_29 = arith.constant 0 : index
      %c0_30 = arith.constant 0 : index
      %c0_31 = arith.constant 0 : index
      %58 = vector.load %arg17[%c0_29, %c0_30, %c0_31] : memref<2x1x32xf32, #tpu.memory_space<vmem>>, vector<1x1x32xf32>
      %59 = vector.shape_cast %58 : vector<1x1x32xf32> to vector<1x32xf32>
      %60 = vector.broadcast %59 : vector<1x32xf32> to vector<16x32xf32>
      %61 = arith.mulf %57, %60 : vector<16x32xf32>
      %c0_32 = arith.constant 0 : index
      %c0_33 = arith.constant 0 : index
      %c0_34 = arith.constant 0 : index
      %62 = vector.load %arg18[%c0_32, %c0_33, %c0_34] : memref<2x1x32xf32, #tpu.memory_space<vmem>>, vector<1x1x32xf32>
      %63 = vector.shape_cast %62 : vector<1x1x32xf32> to vector<1x32xf32>
      %64 = vector.broadcast %63 : vector<1x32xf32> to vector<16x32xf32>
      %65 = arith.addf %61, %64 : vector<16x32xf32>
      %66 = arith.truncf %65 : vector<16x32xf32> to vector<16x32xbf16>
      %c1 = arith.constant 1 : index
      %67 = arith.index_cast %1 : i32 to index
      %c0_35 = arith.constant 0 : index
      %68 = vector.load %arg25[%c1, %67, %c0_35] : memref<3x16x32xbf16, #tpu.memory_space<vmem>>, vector<1x16x32xbf16>
      %69 = vector.shape_cast %68 : vector<1x16x32xbf16> to vector<16x32xbf16>
      %70 = vector.shape_cast %66 : vector<16x32xbf16> to vector<1x16x32xbf16>
      tpu.vector_store %arg25[%c1, %67, %c0_35], %70 {strides = array<i32>} : memref<3x16x32xbf16, #tpu.memory_space<vmem>>, vector<1x16x32xbf16>,
    } else {
    }
    %c2_i32 = arith.constant 2 : i32
    %15 = arith.cmpi eq, %arg0, %c2_i32 : i32
    %16 = arith.extui %15 : i1 to i32
    %c0_i32_6 = arith.constant 0 : i32
    %17 = arith.cmpi ne, %16, %c0_i32_6 : i32
    scf.if %17 {
      %c1 = arith.constant 1 : index
      %c0_9 = arith.constant 0 : index
      %c0_10 = arith.constant 0 : index
      %21 = vector.load %arg25[%c1, %c0_9, %c0_10] : memref<3x16x32xbf16, #tpu.memory_space<vmem>>, vector<1x16x32xbf16>
      %22 = vector.shape_cast %21 : vector<1x16x32xbf16> to vector<16x32xbf16>
      %c0_11 = arith.constant 0 : index
      %c0_12 = arith.constant 0 : index
      %23 = vector.load %arg5[%c0_11, %c0_12] : memref<16x16xbf16, #tpu.memory_space<vmem>>, vector<16x16xbf16>
      %cst = arith.constant dense<0.000000e+00> : vector<16x32xf32>
      %24 = tpu.matmul %23, %22, %cst {dimension_numbers = #tpu.dot_dimension_numbers<[1], [0], [0], [1], [0, 0, 1, 1], [], []>} : vector<16x16xbf16>, vector<16x32xbf16>, vector<16x32xf32> -> vector<16x32xf32>
      %c1_13 = arith.constant 1 : index
      %25 = arith.index_cast %1 : i32 to index
      %c0_14 = arith.constant 0 : index
      %26 = vector.load %arg25[%c1_13, %25, %c0_14] : memref<3x16x32xbf16, #tpu.memory_space<vmem>>, vector<1x16x32xbf16>
      %27 = vector.shape_cast %26 : vector<1x16x32xbf16> to vector<16x32xbf16>
      %28 = arith.extf %27 : vector<16x32xbf16> to vector<16x32xf32>
      %29 = arith.select %3, %24, %28 : vector<16x32xf32>
      %30 = arith.truncf %29 : vector<16x32xf32> to vector<16x32xbf16>
      %c1_15 = arith.constant 1 : index
      %c0_16 = arith.constant 0 : index
      %c0_17 = arith.constant 0 : index
      %31 = vector.load %arg14[%c1_15, %c0_16, %c0_17] : memref<2x32x32xbf16, #tpu.memory_space<vmem>>, vector<1x32x32xbf16>
      %32 = vector.shape_cast %31 : vector<1x32x32xbf16> to vector<32x32xbf16>
      %cst_18 = arith.constant dense<0.000000e+00> : vector<16x32xf32>
      %33 = tpu.matmul %30, %32, %cst_18 {dimension_numbers = #tpu.dot_dimension_numbers<[1], [0], [0], [1], [0, 0, 1, 1], [], []>} : vector<16x32xbf16>, vector<32x32xbf16>, vector<16x32xf32> -> vector<16x32xf32>
      %c1_19 = arith.constant 1 : index
      %c0_20 = arith.constant 0 : index
      %c0_21 = arith.constant 0 : index
      %34 = vector.load %arg26[%c1_19, %c0_20, %c0_21] : memref<2x1x32xf32, #tpu.memory_space<vmem>>, vector<1x1x32xf32>
      %35 = vector.shape_cast %34 : vector<1x1x32xf32> to vector<1x32xf32>
      %36 = vector.broadcast %35 : vector<1x32xf32> to vector<16x32xf32>
      %37 = arith.addf %33, %36 : vector<16x32xf32>
      %cst_22 = arith.constant 0.000000e+00 : f32
      %38 = vector.broadcast %cst_22 : f32 to vector<16x32xf32>
      %39 = arith.maximumf %37, %38 : vector<16x32xf32>
      %cst_23 = arith.constant dense<0.000000e+00> : vector<16xf32>
      %40 = vector.multi_reduction <add>, %39, %cst_23 [1] : vector<16x32xf32> to vector<16xf32>
      %41 = vector.shape_cast %40 : vector<16xf32> to vector<16x1xf32>
      %cst_24 = arith.constant 3.200000e+01 : f32
      %42 = vector.broadcast %cst_24 : f32 to vector<16x1xf32>
      %43 = arith.divf %41, %42 : vector<16x1xf32>
      %44 = vector.broadcast %43 : vector<16x1xf32> to vector<16x32xf32>
      %45 = arith.subf %39, %44 : vector<16x32xf32>
      %46 = arith.mulf %45, %45 : vector<16x32xf32>
      %cst_25 = arith.constant dense<0.000000e+00> : vector<16xf32>
      %47 = vector.multi_reduction <add>, %46, %cst_25 [1] : vector<16x32xf32> to vector<16xf32>
      %48 = vector.shape_cast %47 : vector<16xf32> to vector<16x1xf32>
      %cst_26 = arith.constant 3.200000e+01 : f32
      %49 = vector.broadcast %cst_26 : f32 to vector<16x1xf32>
      %50 = arith.divf %48, %49 : vector<16x1xf32>
      %51 = vector.broadcast %43 : vector<16x1xf32> to vector<16x32xf32>
      %52 = arith.subf %39, %51 : vector<16x32xf32>
      %cst_27 = arith.constant 9.99999974E-6 : f32
      %53 = vector.broadcast %cst_27 : f32 to vector<16x1xf32>
      %54 = arith.addf %50, %53 : vector<16x1xf32>
      %55 = math.rsqrt %54 : vector<16x1xf32>
      %56 = vector.broadcast %55 : vector<16x1xf32> to vector<16x32xf32>
      %57 = arith.mulf %52, %56 : vector<16x32xf32>
      %c1_28 = arith.constant 1 : index
      %c0_29 = arith.constant 0 : index
      %c0_30 = arith.constant 0 : index
      %58 = vector.load %arg17[%c1_28, %c0_29, %c0_30] : memref<2x1x32xf32, #tpu.memory_space<vmem>>, vector<1x1x32xf32>
      %59 = vector.shape_cast %58 : vector<1x1x32xf32> to vector<1x32xf32>
      %60 = vector.broadcast %59 : vector<1x32xf32> to vector<16x32xf32>
      %61 = arith.mulf %57, %60 : vector<16x32xf32>
      %c1_31 = arith.constant 1 : index
      %c0_32 = arith.constant 0 : index
      %c0_33 = arith.constant 0 : index
      %62 = vector.load %arg18[%c1_31, %c0_32, %c0_33] : memref<2x1x32xf32, #tpu.memory_space<vmem>>, vector<1x1x32xf32>
      %63 = vector.shape_cast %62 : vector<1x1x32xf32> to vector<1x32xf32>
      %64 = vector.broadcast %63 : vector<1x32xf32> to vector<16x32xf32>
      %65 = arith.addf %61, %64 : vector<16x32xf32>
      %66 = arith.truncf %65 : vector<16x32xf32> to vector<16x32xbf16>
      %c2 = arith.constant 2 : index
      %67 = arith.index_cast %1 : i32 to index
      %c0_34 = arith.constant 0 : index
      %68 = vector.load %arg25[%c2, %67, %c0_34] : memref<3x16x32xbf16, #tpu.memory_space<vmem>>, vector<1x16x32xbf16>
      %69 = vector.shape_cast %68 : vector<1x16x32xbf16> to vector<16x32xbf16>
      %70 = vector.shape_cast %66 : vector<16x32xbf16> to vector<1x16x32xbf16>
      tpu.vector_store %arg25[%c2, %67, %c0_34], %70 {strides = array<i32>} : memref<3x16x32xbf16, #tpu.memory_space<vmem>>, vector<1x16x32xbf16>,
    } else {
    }
    %c2_i32_7 = arith.constant 2 : i32
    %18 = arith.cmpi eq, %arg0, %c2_i32_7 : i32
    %19 = arith.extui %18 : i1 to i32
    %c0_i32_8 = arith.constant 0 : i32
    %20 = arith.cmpi ne, %19, %c0_i32_8 : i32
    scf.if %20 {
      %c0_9 = arith.constant 0 : index
      %21 = arith.index_cast %1 : i32 to index
      %c0_10 = arith.constant 0 : index
      %22 = vector.load %arg25[%c0_9, %21, %c0_10] : memref<3x16x32xbf16, #tpu.memory_space<vmem>>, vector<1x16x32xbf16>
      %23 = vector.shape_cast %22 : vector<1x16x32xbf16> to vector<16x32xbf16>
      %c1 = arith.constant 1 : index
      %24 = arith.index_cast %1 : i32 to index
      %c0_11 = arith.constant 0 : index
      %25 = vector.load %arg25[%c1, %24, %c0_11] : memref<3x16x32xbf16, #tpu.memory_space<vmem>>, vector<1x16x32xbf16>
      %26 = vector.shape_cast %25 : vector<1x16x32xbf16> to vector<16x32xbf16>
      %c2 = arith.constant 2 : index
      %27 = arith.index_cast %1 : i32 to index
      %c0_12 = arith.constant 0 : index
      %28 = vector.load %arg25[%c2, %27, %c0_12] : memref<3x16x32xbf16, #tpu.memory_space<vmem>>, vector<1x16x32xbf16>
      %29 = vector.shape_cast %28 : vector<1x16x32xbf16> to vector<16x32xbf16>
      %30 = tpu.concatenate %23, %26, %29 in 1 : vector<16x32xbf16>, vector<16x32xbf16>, vector<16x32xbf16> -> vector<16x96xbf16>
      %c0_13 = arith.constant 0 : index
      %c0_14 = arith.constant 0 : index
      %31 = vector.load %arg19[%c0_13, %c0_14] : memref<96x128xbf16, #tpu.memory_space<vmem>>, vector<96x128xbf16>
      %cst = arith.constant dense<0.000000e+00> : vector<16x128xf32>
      %32 = tpu.matmul %30, %31, %cst {dimension_numbers = #tpu.dot_dimension_numbers<[1], [0], [0], [1], [0, 0, 1, 1], [], []>} : vector<16x96xbf16>, vector<96x128xbf16>, vector<16x128xf32> -> vector<16x128xf32>
      %c0_15 = arith.constant 0 : index
      %c0_16 = arith.constant 0 : index
      %33 = vector.load %arg27[%c0_15, %c0_16] : memref<1x128xf32, #tpu.memory_space<vmem>>, vector<1x128xf32>
      %34 = vector.broadcast %33 : vector<1x128xf32> to vector<16x128xf32>
      %35 = arith.addf %32, %34 : vector<16x128xf32>
      %cst_17 = arith.constant 0.000000e+00 : f32
      %36 = vector.broadcast %cst_17 : f32 to vector<16x128xf32>
      %37 = arith.maximumf %35, %36 : vector<16x128xf32>
      %38 = arith.truncf %37 : vector<16x128xf32> to vector<16x128xbf16>
      %c0_18 = arith.constant 0 : index
      %c0_19 = arith.constant 0 : index
      %39 = vector.load %arg22[%c0_18, %c0_19] : memref<128x128xbf16, #tpu.memory_space<vmem>>, vector<128x128xbf16>
      %cst_20 = arith.constant dense<0.000000e+00> : vector<16x128xf32>
      %40 = tpu.matmul %38, %39, %cst_20 {dimension_numbers = #tpu.dot_dimension_numbers<[1], [0], [0], [1], [0, 0, 1, 1], [], []>} : vector<16x128xbf16>, vector<128x128xbf16>, vector<16x128xf32> -> vector<16x128xf32>
      %c0_21 = arith.constant 0 : index
      %c0_22 = arith.constant 0 : index
      %41 = vector.load %arg23[%c0_21, %c0_22] : memref<1x128xf32, #tpu.memory_space<vmem>>, vector<1x128xf32>
      %42 = vector.broadcast %41 : vector<1x128xf32> to vector<16x128xf32>
      %43 = arith.addf %40, %42 : vector<16x128xf32>
      %c0_23 = arith.constant 0 : index
      %c0_24 = arith.constant 0 : index
      %44 = vector.load %arg24[%c0_23, %c0_24] : memref<16x128xf32, #tpu.memory_space<vmem>>, vector<16x128xf32>
      tpu.vector_store %arg24[%c0_23, %c0_24], %43 {strides = array<i32>} : memref<16x128xf32, #tpu.memory_space<vmem>>, vector<16x128xf32>,
    } else {
    }
    return
  }
  func.func @transform_0(%arg0: i32, %arg1: i32, %arg2: memref<1xi32, #tpu.memory_space<smem>>) -> (i32, i32) {
    %c0_i32 = arith.constant 0 : i32
    %c0_i32_0 = arith.constant 0 : i32
    %c0_i32_1 = arith.constant 0 : i32
    return %c0_i32, %c0_i32_0 : i32, i32
  }
  func.func @transform_1(%arg0: i32, %arg1: i32, %arg2: memref<1xi32, #tpu.memory_space<smem>>) -> (i32, i32) {
    %c0_i32 = arith.constant 0 : i32
    %c0_i32_0 = arith.constant 0 : i32
    return %arg1, %c0_i32 : i32, i32
  }
  func.func @transform_2(%arg0: i32, %arg1: i32, %arg2: memref<1xi32, #tpu.memory_space<smem>>) -> (i32, i32) {
    %c1_i32 = arith.constant 1 : i32
    %0 = arith.minsi %arg0, %c1_i32 : i32
    %1 = arith.muli %arg1, %0 : i32
    %c0_i32 = arith.constant 0 : i32
    %c0_i32_0 = arith.constant 0 : i32
    return %1, %c0_i32 : i32, i32
  }
  func.func @transform_3(%arg0: i32, %arg1: i32, %arg2: memref<1xi32, #tpu.memory_space<smem>>) -> (i32, i32) {
    %c0_i32 = arith.constant 0 : i32
    %c0_i32_0 = arith.constant 0 : i32
    %c0_i32_1 = arith.constant 0 : i32
    return %c0_i32, %c0_i32_0 : i32, i32
  }
  func.func @transform_4(%arg0: i32, %arg1: i32, %arg2: memref<1xi32, #tpu.memory_space<smem>>) -> (i32, i32) {
    %c0_i32 = arith.constant 0 : i32
    %c0_i32_0 = arith.constant 0 : i32
    %c0_i32_1 = arith.constant 0 : i32
    return %c0_i32, %c0_i32_0 : i32, i32
  }
  func.func @transform_5(%arg0: i32, %arg1: i32, %arg2: memref<1xi32, #tpu.memory_space<smem>>) -> (i32, i32) {
    %c0_i32 = arith.constant 0 : i32
    %c0_i32_0 = arith.constant 0 : i32
    %c0_i32_1 = arith.constant 0 : i32
    return %c0_i32, %c0_i32_0 : i32, i32
  }
  func.func @transform_6(%arg0: i32, %arg1: i32, %arg2: memref<1xi32, #tpu.memory_space<smem>>) -> (i32, i32) {
    %c0_i32 = arith.constant 0 : i32
    %c0_i32_0 = arith.constant 0 : i32
    %c0_i32_1 = arith.constant 0 : i32
    return %c0_i32, %c0_i32_0 : i32, i32
  }
  func.func @transform_7(%arg0: i32, %arg1: i32, %arg2: memref<1xi32, #tpu.memory_space<smem>>) -> (i32, i32) {
    %c0_i32 = arith.constant 0 : i32
    %c0_i32_0 = arith.constant 0 : i32
    %c0_i32_1 = arith.constant 0 : i32
    return %c0_i32, %c0_i32_0 : i32, i32
  }
  func.func @transform_8(%arg0: i32, %arg1: i32, %arg2: memref<1xi32, #tpu.memory_space<smem>>) -> (i32, i32) {
    %c0_i32 = arith.constant 0 : i32
    %c0_i32_0 = arith.constant 0 : i32
    %c0_i32_1 = arith.constant 0 : i32
    return %c0_i32, %c0_i32_0 : i32, i32
  }
  func.func @transform_9(%arg0: i32, %arg1: i32, %arg2: memref<1xi32, #tpu.memory_space<smem>>) -> (i32, i32) {
    %c0_i32 = arith.constant 0 : i32
    %c0_i32_0 = arith.constant 0 : i32
    %c0_i32_1 = arith.constant 0 : i32
    return %c0_i32, %c0_i32_0 : i32, i32
  }
  func.func @transform_10(%arg0: i32, %arg1: i32, %arg2: memref<1xi32, #tpu.memory_space<smem>>) -> (i32, i32) {
    %c0_i32 = arith.constant 0 : i32
    %c0_i32_0 = arith.constant 0 : i32
    %c0_i32_1 = arith.constant 0 : i32
    return %c0_i32, %c0_i32_0 : i32, i32
  }
  func.func @transform_11(%arg0: i32, %arg1: i32, %arg2: memref<1xi32, #tpu.memory_space<smem>>) -> (i32, i32, i32) {
    %c0_i32 = arith.constant 0 : i32
    %c0_i32_0 = arith.constant 0 : i32
    %c0_i32_1 = arith.constant 0 : i32
    %c0_i32_2 = arith.constant 0 : i32
    return %c0_i32, %c0_i32_0, %c0_i32_1 : i32, i32, i32
  }
  func.func @transform_12(%arg0: i32, %arg1: i32, %arg2: memref<1xi32, #tpu.memory_space<smem>>) -> (i32, i32, i32) {
    %c0_i32 = arith.constant 0 : i32
    %c0_i32_0 = arith.constant 0 : i32
    %c0_i32_1 = arith.constant 0 : i32
    %c0_i32_2 = arith.constant 0 : i32
    return %c0_i32, %c0_i32_0, %c0_i32_1 : i32, i32, i32
  }
  func.func @transform_13(%arg0: i32, %arg1: i32, %arg2: memref<1xi32, #tpu.memory_space<smem>>) -> (i32, i32, i32) {
    %c0_i32 = arith.constant 0 : i32
    %c0_i32_0 = arith.constant 0 : i32
    %c0_i32_1 = arith.constant 0 : i32
    %c0_i32_2 = arith.constant 0 : i32
    return %c0_i32, %c0_i32_0, %c0_i32_1 : i32, i32, i32
  }
  func.func @transform_14(%arg0: i32, %arg1: i32, %arg2: memref<1xi32, #tpu.memory_space<smem>>) -> (i32, i32, i32) {
    %c0_i32 = arith.constant 0 : i32
    %c0_i32_0 = arith.constant 0 : i32
    %c0_i32_1 = arith.constant 0 : i32
    %c0_i32_2 = arith.constant 0 : i32
    return %c0_i32, %c0_i32_0, %c0_i32_1 : i32, i32, i32
  }
  func.func @transform_15(%arg0: i32, %arg1: i32, %arg2: memref<1xi32, #tpu.memory_space<smem>>) -> (i32, i32, i32) {
    %c0_i32 = arith.constant 0 : i32
    %c0_i32_0 = arith.constant 0 : i32
    %c0_i32_1 = arith.constant 0 : i32
    %c0_i32_2 = arith.constant 0 : i32
    return %c0_i32, %c0_i32_0, %c0_i32_1 : i32, i32, i32
  }
  func.func @transform_16(%arg0: i32, %arg1: i32, %arg2: memref<1xi32, #tpu.memory_space<smem>>) -> (i32, i32) {
    %c0_i32 = arith.constant 0 : i32
    %c0_i32_0 = arith.constant 0 : i32
    %c0_i32_1 = arith.constant 0 : i32
    return %c0_i32, %c0_i32_0 : i32, i32
  }
  func.func @transform_17(%arg0: i32, %arg1: i32, %arg2: memref<1xi32, #tpu.memory_space<smem>>) -> (i32, i32) {
    %c0_i32 = arith.constant 0 : i32
    %c0_i32_0 = arith.constant 0 : i32
    %c0_i32_1 = arith.constant 0 : i32
    return %c0_i32, %c0_i32_0 : i32, i32
  }
  func.func @transform_18(%arg0: i32, %arg1: i32, %arg2: memref<1xi32, #tpu.memory_space<smem>>) -> (i32, i32) {
    %c0_i32 = arith.constant 0 : i32
    %c0_i32_0 = arith.constant 0 : i32
    %c0_i32_1 = arith.constant 0 : i32
    return %c0_i32, %c0_i32_0 : i32, i32
  }
  func.func @transform_19(%arg0: i32, %arg1: i32, %arg2: memref<1xi32, #tpu.memory_space<smem>>) -> (i32, i32) {
    %c0_i32 = arith.constant 0 : i32
    %c0_i32_0 = arith.constant 0 : i32
    %c0_i32_1 = arith.constant 0 : i32
    return %c0_i32, %c0_i32_0 : i32, i32
  }
  func.func @transform_20(%arg0: i32, %arg1: i32, %arg2: memref<1xi32, #tpu.memory_space<smem>>) -> (i32, i32) {
    %c0_i32 = arith.constant 0 : i32
    %c0_i32_0 = arith.constant 0 : i32
    %c0_i32_1 = arith.constant 0 : i32
    return %c0_i32, %c0_i32_0 : i32, i32
  }
  func.func @transform_21(%arg0: i32, %arg1: i32, %arg2: memref<1xi32, #tpu.memory_space<smem>>) -> (i32, i32) {
    %c1_i32 = arith.constant 1 : i32
    %0 = arith.subi %arg0, %c1_i32 : i32
    %c0_i32 = arith.constant 0 : i32
    %1 = arith.maxsi %0, %c0_i32 : i32
    %2 = arith.muli %arg1, %1 : i32
    %c0_i32_0 = arith.constant 0 : i32
    %c0_i32_1 = arith.constant 0 : i32
    return %2, %c0_i32_0 : i32, i32
  }
}

</mosaic_0001>

<bundles_post_ra>
// kernel: gnn_tower_forward.1
= control target key start
LH: loop header
LB: loop body
LE: loop exit
PB: predicated region body
PF: predicated region fallthrough
CT: control target
= control target key end

     0   :  { %s2235_s0 = inlined_call_operand.<no memory space> [shape: s32[1], index: 0, kind: input, shape index: {}]   ;;  %s2236_s1 = inlined_call_operand.<no memory space> [shape: f32[1,1], index: 1, kind: input, shape index: {}]   ;;  %s2237_s2 = inlined_call_operand.vmem [shape: bf16[16,8], index: 2, kind: input, shape index: {}]   ;;  %s2238_s3 = inlined_call_operand.vmem [shape: bf16[16,16], index: 3, kind: input, shape index: {}]   ;;  %s2239_s4 = inlined_call_operand.vmem [shape: f32[1,16], index: 4, kind: input, shape index: {}]   ;;  %s2240_s5 = inlined_call_operand.vmem [shape: f32[1,16], index: 5, kind: input, shape index: {}]   ;;  %s2241_s6 = inlined_call_operand.vmem [shape: f32[16,16], index: 6, kind: input, shape index: {}]   ;;  %s2242_s7 = inlined_call_operand.vmem [shape: f32[1,16], index: 7, kind: input, shape index: {}]   ;;  %s2243_s8 = inlined_call_operand.vmem [shape: bf16[8,32], index: 8, kind: input, shape index: {}]   ;;  %s2244_s9 = inlined_call_operand.vmem [shape: f32[1,32], index: 9, kind: input, shape index: {}]   ;;  %s2245_s10 = inlined_call_operand.vmem [shape: bf16[32,32], index: 10, kind: input, shape index: {}]   ;;  %s2246_s11 = inlined_call_operand.vmem [shape: f32[1,32], index: 11, kind: input, shape index: {}]   ;;  %s2247_s12 = inlined_call_operand.vmem [shape: bf16[2,32,32], index: 12, kind: input, shape index: {}]   ;;  %s2248_s13 = inlined_call_operand.vmem [shape: f32[2,16,32], index: 13, kind: input, shape index: {}]   ;;  %s2249_s14 = inlined_call_operand.vmem [shape: f32[2,1,32], index: 14, kind: input, shape index: {}]   ;;  %s2250_s15 = inlined_call_operand.vmem [shape: f32[2,1,32], index: 15, kind: input, shape index: {}]   ;;  %s2251_s16 = inlined_call_operand.vmem [shape: f32[2,1,32], index: 16, kind: input, shape index: {}]   ;;  %s2252_s17 = inlined_call_operand.vmem [shape: bf16[96,128], index: 17, kind: input, shape index: {}]   ;;  %s2253_s18 = inlined_call_operand.vmem [shape: f32[16,128], index: 18, kind: input, shape index: {}]   ;;  %s2254_s19 = inlined_call_operand.vmem [shape: f32[1,128], index: 19, kind: input, shape index: {}]   ;;  %s2255_s20 = inlined_call_operand.vmem [shape: bf16[128,128], index: 20, kind: input, shape index: {}]   ;;  %s2256_s21 = inlined_call_operand.vmem [shape: f32[1,128], index: 21, kind: input, shape index: {}]   ;;  %s2257_s22 = inlined_call_operand.hbm [shape: f32[16,128], index: 22, kind: output, shape index: {}]  }
   0x1   :  { %2260 = sst [smem:[#allocation11_spill]] %s2235_s0 }
   0x2   :  { %2261 = sst [smem:[#allocation12_spill]] %s2236_s1 }
   0x3   :  { %2262 = sst [smem:[#allocation13_spill]] %s2237_s2 }
   0x4   :  { %2263 = sst [smem:[#allocation14_spill]] %s2238_s3 }
   0x5   :  { %2264 = sst [smem:[#allocation15_spill]] %s2239_s4 }
   0x6   :  { %2265 = sst [smem:[#allocation16_spill]] %s2240_s5 }
   0x7   :  { %2266 = sst [smem:[#allocation17_spill]] %s2241_s6 }
   0x8   :  { %2267 = sst [smem:[#allocation18_spill]] %s2252_s17 }
   0x9   :  { %s2268_s29 = sld [smem:[#allocation11_spill]] }
   0xa   :  { %s2269_s17 = sld [smem:[#allocation12_spill]] }
   0xf   :  { %27 = sst [smem:[#allocation6]] %s2268_s29 }
  0x10   :  { %v28_v0 = vstv %s2269_s17 }
  0x11   :  { %29 = vst [vmem:[#allocation7] sm:$0x1] %v28_v0 }
  0x12   :  { %30 = vsyncpa [#allocation9], 0 }
  0x13   :  { %32 = vsyncpa [#allocation9 + $0x1], 0  ;;  %s2035_s0 = smov 0   ;;  %s2037_s23 = smov 0  }
  0x14   :  { %s2039_s1 = smov 0  }
  0x15 LB: > { %s50_s24 = sadd.s32 1, %s1900_s23  ;;  %p1594_p0 = scmp.ge.s32.totalorder %s1904_s1, 1  ;;  %s1904_s1 = sphi %s2039_s1, %s38_s1   ;;  %s1900_s23 = sphi %s2037_s23, %s2280_s23   ;;  %s1896_s0 = sphi %s2035_s0, %s2279_s0  }
  0x16   : > { %p52_p1 = scmp.ge.s32.totalorder %s50_s24, 3  ;;  %p638_p2 = scmp.lt.s32.totalorder %s1904_s1, 4 }
  0x18   : > { %s2282_s24 = smov (%p52_p1, %s50_s24), 0  ;;  %p639_p3 = pnand %p1594_p0, %p638_p2 }
  0x19   : > { %s2057_s6 = sld [smem:[#allocation6]] (!%p639_p3)  ;;  %p733_p4 = scmp.eq.s32.totalorder (!%p639_p3), %s1896_s0, 0 }
  0x1a   : > { %642 = sbr.rel (%p639_p3) target bundleno = 2222 (0x8ae), region = 104 }
  0x1f   : > { %p732_p5 = scmp.ne.s32.totalorder %s2057_s6, 0  ;;  %738 = sbr.rel (!%p733_p4) target bundleno = 422 (0x1a6), region = 108  ;;  %v739_v1 = vld [vmem:[#allocation7] sm:$0x1] (%p733_p4)  ;;  %v1906_v2 = vmov (%p733_p4), 0   ;;  %vm754_vm0 = vcmask (%p733_p4), 130048  }
  0x20   : > { %1827 = vset.pattern.permute.xlu0 (%p733_p4), %v1906_v2  ;;  %s2270_s2 = sld [smem:[#allocation17_spill]] (%p733_p4)  ;;  %v780_v12 = vld [vmem:[%s2248_s13 + $0x8] sm:$0xff] (%p733_p4)  ;;  %v1599_v13 = vld [vmem:[%s2248_s13 + $0x18] sm:$0xff] (%p733_p4)  ;;  %v779_v15 = vld [vmem:[%s2248_s13] sm:$0xff] (%p733_p4)  ;;  %vm805_vm1 = vcmask (%p733_p4), 253952  }
  0x21   : > { %743 = vperm.xlu0 (%p733_p4), %1827, %v739_v1   ;;  %s2271_s30 = sld [smem:[#allocation15_spill]] (%p733_p4)  ;;  %v835_v14 = vld [vmem:[%s2253_s18 + $0x8] sm:$0xff] (%p733_p4)  ;;  %799 = vmatpush.msra.mxu1 (%p733_p4), %v780_v12  ;;  %v1598_v16 = vld [vmem:[%s2248_s13 + $0x10] sm:$0xff] (%p733_p4)  ;;  %v834_v17 = vld [vmem:[%s2253_s18] sm:$0xff] (%p733_p4) }
  0x22   : > { %s2272_s17 = sld [smem:[#allocation16_spill]] (%p733_p4)  ;;  %826 = vmatpush.msra.mxu2 (%p733_p4), %v1599_v13  ;;  %851 = vmatpush.msra.mxu3 (%p733_p4), %v835_v14  ;;  %v753_v18 = vld [vmem:[%s2242_s7] sm:$0x1] (%p733_p4)  ;;  %v1600_v25 = vld [vmem:[%s2249_s14 + $0x1] sm:$0x1] (%p733_p4) }
  0x23   : > { %800 = vmatpush.msra.mxu1 (%p733_p4), %v779_v15  ;;  %v781_v22 = vld [vmem:[%s2249_s14] sm:$0x1] (%p733_p4) }
  0x24   : > { %827 = vmatpush.msra.mxu2 %v1598_v16  ;;  %852 = vmatpush.msra.mxu3 %v834_v17  ;;  %v836_v26 = vld [vmem:[%s2254_s19] sm:$0x1] }
  0x26   : > { %v752_v3 = vld [vmem:[%s2270_s2 + $0x8] sm:$0xff]  ;;  %v751_v4 = vld [vmem:[%s2270_s2] sm:$0xff] }
  0x27   : > { %772 = vmatpush.msra.mxu0 %v752_v3  ;;  %v740_v5 = vld [vmem:[%s2271_s30] sm:$0x1] }
  0x28   : > { %v748_v8 = vld [vmem:[%s2272_s17] sm:$0x1] }
  0x29   : > { %773 = vmatpush.msra.mxu0 %v751_v4 }
  0x93   : > { %v744_v6 = vpop.permute.xlu0 %743 }
  0x94   : > { %v746_v7 = vperm.slane %v744_v6, 0 }
  0x96   : > { %v747_v9 = vmul.f32 %v746_v7, %v740_v5 }
  0x98   : > { %v749_v10 = vadd.f32 %v748_v8, %v747_v9 }
  0x9a   : > { %v750_v11 = vmax.f32 %v749_v10, 0.0 }
  0x9c   : > { %1596 = vmatmul.msk.f32.vlgmr.msra.gmra.mxu0 %vm754_vm0, %v750_v11 }
 0x119   : > { %v775_v19 = vpop.f32.mrf.mxu0 }
 0x11a   : > { %v776_v20 = vadd.f32 %v775_v19, %v753_v18 }
 0x11c   : > { %v778_v21 = vmax.f32 %v776_v20, 0.0 }
 0x11e   : > { %1597 = vmatmul.msk.f32.vlgmr.msra.gmra.mxu1 %vm754_vm0, %v778_v21  ;;  %1601 = vmatmul.msk.f32.vlgmr.msra.gmra.mxu2 %vm754_vm0, %v778_v21 }
 0x11f   : > { %1602 = vmatmul.msk.f32.vlgmr.msra.gmra.mxu3 %vm754_vm0, %v778_v21 }
 0x19b   : > { %v802_v23 = vpop.f32.mrf.mxu1 }
 0x19c   : > { %v803_v24 = vadd.f32 %v802_v23, %v781_v22 }
 0x19e   : > { %806 = vst.msk [vmem:[#allocation3] sm:$0x1] %vm805_vm1, %v803_v24 }
 0x1a1   : > { %v829_v27 = vpop.f32.mrf.mxu2 }
 0x1a2   : > { %v830_v28 = vadd.f32 %v1600_v25, %v829_v27  ;;  %v854_v29 = vpop.f32.mrf.mxu3 }
 0x1a3   : > { %v855_v30 = vadd.f32 %v854_v29, %v836_v26 }
 0x1a4   : > { %833 = vst.msk [vmem:[#allocation3 + $0x1] sm:$0x1] %vm805_vm1, %v830_v28 }
 0x1a5   : > { %857 = vst [vmem:[#allocation4] sm:$0x1] %v855_v30 }
 0x1a6 PF: > { %p1603_p6 = scmp.ne.s32.totalorder %s1896_s0, 0 }
 0x1a7   : > { %s2273_s28 = sld [smem:[#allocation13_spill]] (!%p1603_p6) }
 0x1a8   : > { %860 = sbr.rel (%p1603_p6) target bundleno = 715 (0x2cb), region = 112 }
 0x1ad   : > { %v863_v31 = vld [vmem:[%s2243_s8] sm:$0xf]  ;;  %vm877_vm2 = vcmask 1043456   ;;  %vm873_vm3 = vcmask 64512   ;;  %v1749_v34 = vld [vmem:[%s2245_s10 + $0x8] sm:$0xff]  ;;  %vm918_vm4 = vcmask 261120  }
 0x1ae   : > { %v879_v32 = vsel %vm877_vm2, %v863_v31, 0  ;;  %v1747_v33 = vld [vmem:[%s2273_s28] sm:$0xff]  ;;  %928 = vmatpush.bf16.msra.mxu1 %v1749_v34  ;;  %vm944_vm5 = vcmask 257024  }
 0x1af   : > { %888 = vmatpush.bf16.msra.mxu0 %v879_v32  ;;  %v1748_v35 = vld [vmem:[%s2245_s10] sm:$0xff] }
 0x1b0   : > { %v1828_v37 = vld [vmem:[%s2244_s9] ss:$0 sm:$0xff] }
 0x1b1   : > { %v1829_v44 = vld [vmem:[%s2246_s11] ss:$0 sm:$0xff] }
 0x1b2   : > { %1608 = vmatmul.msk.bf16.vlgmr.msra.gmra.mxu0 %vm873_vm3, %v1747_v33  ;;  %929 = vmatpush.bf16.msra.mxu1 %v1748_v35 }
 0x22f   : > { %v890_v36 = vpop.f32.mrf.mxu0 }
 0x230   : > { %v891_v38 = vadd.f32 %v1828_v37, %v890_v36 }
 0x232   : > { %v895_v41 = vmax.f32 %v891_v38, 0.0 }
 0x237   : > { %v892_v39 = vpop.f32.mrf.mxu0 }
 0x238   : > { %v893_v40 = vadd.f32 %v1828_v37, %v892_v39 }
 0x23a   : > { %v896_v42 = vmax.f32 %v893_v40, 0.0 }
 0x23c   : > { %v897_v43 = vpack.c.bf16 %v896_v42, %v895_v41 }
 0x23e   : > { %1617 = vmatmul.msk.bf16.vlgmr.msra.gmra.mxu1 %vm918_vm4, %v897_v43 }
 0x2bb   : > { %v931_v45 = vpop.f32.mrf.mxu1 }
 0x2bc   : > { %v932_v46 = vadd.f32 %v1829_v44, %v931_v45 }
 0x2be   : > { %v936_v47 = vmax.f32 %v932_v46, 0.0 }
 0x2c0   : > { %v938_v48 = vpack.c.bf16 %v936_v47, %v936_v47 }
 0x2c2   : > { %945 = vst.msk [vmem:[#allocation2] sm:$0xf] %vm944_vm5, %v938_v48 }
 0x2c3   : > { %v933_v49 = vpop.f32.mrf.mxu1 }
 0x2c4   : > { %v934_v50 = vadd.f32 %v1829_v44, %v933_v49 }
 0x2c6   : > { %v937_v51 = vmax.f32 %v934_v50, 0.0 }
 0x2c8   : > { %v939_v52 = vpack.c.bf16 %v937_v51, %v937_v51 }
 0x2ca   : > { %946 = vst.msk [vmem:[#allocation2 + $0x4] sm:$0xf] %vm944_vm5, %v939_v52 }
 0x2cb PF: > { %p1618_p7 = scmp.ne.s32.totalorder %s1896_s0, 1 }
 0x2cc   : > { %s2274_s29 = sld [smem:[#allocation14_spill]] (!%p1618_p7) }
 0x2cd   : > { %950 = sbr.rel (%p1618_p7) target bundleno = 1272 (0x4f8), region = 116 }
 0x2d2   : > { %v1750_v53 = vld [vmem:[#allocation2] sm:$0xff]  ;;  %vm966_vm6 = vcmask 130048   ;;  %v1753_v55 = vld [vmem:[%s2247_s12 + $0x8] sm:$0xff]  ;;  %s992_s25 = scalar_select %p732_p5, 1, 0  ;;  %vm1018_vm8 = vcmask 261120  }
 0x2d3   : > { %v1751_v54 = vld [vmem:[%s2274_s29] sm:$0xff]  ;;  %977 = vmatpush.bf16.msra.mxu0 %v1750_v53  ;;  %1028 = vmatpush.bf16.msra.mxu1 %v1753_v55  ;;  %v1830_v2 = vld [vmem:[#allocation3] ss:$0 sm:$0xff]  ;;  %v1907_v11 = vmov 32.0   ;;  %vm1106_vm14 = vcmask 257024  }
 0x2d4   : > { %v1752_v56 = vld [vmem:[%s2247_s12] sm:$0xff]  ;;  %v993_v59 = vstv %s992_s25  ;;  %1833 = vrcp.f32 %v1907_v11 }
 0x2d5   : > { %v1776_v58 = vld [vmem:[#allocation2] sm:$0xff]   ;;  %vm994_vm7 = vcmp.eq.s32.totalorder %v993_v59, 1 }
 0x2d6   : > { %1627 = vmatmul.msk.bf16.vlgmr.msra.gmra.mxu0 %vm966_vm6, %v1751_v54  ;;  %v1777_v60 = vunpack.c.l.bf16 %v1776_v58  ;;  %v1778_v61 = vunpack.c.h.bf16 %v1776_v58  ;;  %v1831_v42 = vld [vmem:[%s2250_s15] ss:$0 sm:$0xff] }
 0x2d7   : > { %1029 = vmatpush.bf16.msra.mxu1 %v1752_v56  ;;  %v1832_v45 = vld [vmem:[%s2251_s16] ss:$0 sm:$0xff] }
 0x2da   : > { %v1834_v12 = vpop.eup %1833 }
 0x2db   : > { %v1045_v13 = vmul.f32 32.0, %v1834_v12  ;;  %vm1049_vm9 = vweird.f32 %v1834_v12 }
 0x2dd   : > { %v1046_v14 = vsub.f32 1.0, %v1045_v13 }
 0x2df   : > { %v1047_v15 = vmul.f32 %v1834_v12, %v1046_v14 }
 0x2e1   : > { %v1048_v16 = vadd.f32 %v1834_v12, %v1047_v15 }
 0x2e3   : > { %v1050_v17 = vsel %vm1049_vm9, %v1834_v12, %v1048_v16 }
 0x353   : > { %v979_v57 = vpop.f32.mrf.mxu0 }
 0x354   : > { %v995_v63 = vsel %vm994_vm7, %v979_v57, %v1777_v60 }
 0x35b   : > { %v981_v62 = vpop.f32.mrf.mxu0 }
 0x35c   : > { %v996_v0 = vsel %vm994_vm7, %v981_v62, %v1778_v61 }
 0x35d   : > { %v997_v1 = vpack.c.bf16 %v996_v0, %v995_v63 }
 0x35f   : > { %1636 = vmatmul.msk.bf16.vlgmr.msra.gmra.mxu1 %vm1018_vm8, %v997_v1 }
 0x3dc   : > { %v1031_v3 = vpop.f32.mrf.mxu1 }
 0x3dd   : > { %v1032_v4 = vadd.f32 %v1830_v2, %v1031_v3 }
 0x3df   : > { %v1036_v5 = vmax.f32 %v1032_v4, 0.0 }
 0x3e1   : > { %v1038_v6 = vsel %vm1018_vm8, %v1036_v5, 0.0 }
 0x3e2   : > { %1039 = vadd.xlane.f32.xlu0 %v1038_v6 }
 0x3e4   : > { %v1033_v7 = vpop.f32.mrf.mxu1 }
 0x3e5   : > { %v1034_v8 = vadd.f32 %v1830_v2, %v1033_v7 }
 0x3e7   : > { %v1037_v9 = vmax.f32 %v1034_v8, 0.0 }
 0x3e9   : > { %v1041_v10 = vsel %vm1018_vm8, %v1037_v9, 0.0 }
 0x3ea   : > { %1042 = vadd.xlane.f32.xlu0 %v1041_v10 }
 0x455   : > { %v1040_v18 = vpop.xlane.xlu0 %1039 }
 0x456   : > { %v1051_v19 = vmul.f32 %v1050_v17, %v1040_v18 }
 0x458   : > { %v1053_v20 = vsub.f32 %v1036_v5, %v1051_v19 }
 0x45a   : > { %v1055_v21 = vmul.f32 %v1053_v20, %v1053_v20 }
 0x45c   : > { %v1057_v22 = vsel %vm1018_vm8, %v1055_v21, 0.0 }
 0x45d   : > { %1058 = vadd.xlane.f32.xlu1 %v1057_v22  ;;  %v1043_v23 = vpop.xlane.xlu0 %1042 }
 0x45e   : > { %v1052_v24 = vmul.f32 %v1050_v17, %v1043_v23 }
 0x460   : > { %v1054_v25 = vsub.f32 %v1037_v9, %v1052_v24 }
 0x462   : > { %v1056_v26 = vmul.f32 %v1054_v25, %v1054_v25 }
 0x464   : > { %v1060_v27 = vsel %vm1018_vm8, %v1056_v26, 0.0 }
 0x465   : > { %1061 = vadd.xlane.f32.xlu1 %v1060_v27 }
 0x4d0   : > { %v1059_v28 = vpop.xlane.xlu1 %1058 }
 0x4d1   : > { %v1063_v29 = vmul.f32 %v1059_v28, %v1050_v17 }
 0x4d3   : > { %v1065_v30 = vadd.f32 1e-05, %v1063_v29 }
 0x4d5   : > { %1835 = vrsqrt.f32 %v1065_v30  ;;  %vm1073_vm11 = vweird.f32 %v1065_v30 }
 0x4d8   : > { %v1062_v31 = vpop.xlane.xlu1 %1061 }
 0x4d9   : > { %v1064_v32 = vmul.f32 %v1062_v31, %v1050_v17 }
 0x4db   : > { %v1836_v33 = vpop.eup %1835  ;;  %v1066_v34 = vadd.f32 1e-05, %v1064_v32 }
 0x4dc   : > { %v1068_v35 = vmul.f32 %v1836_v33, %v1065_v30  ;;  %vm1074_vm10 = vweird.f32 %v1836_v33 }
 0x4dd   : > { %1837 = vrsqrt.f32 %v1066_v34  ;;  %vm1075_vm12 = vmor %vm1073_vm11, %vm1074_vm10  ;;  %vm1083_vm15 = vweird.f32 %v1066_v34 }
 0x4de   : > { %v1069_v36 = vmul.f32 %v1836_v33, %v1068_v35 }
 0x4e0   : > { %v1070_v37 = vmul.f32 0.5, %v1069_v36 }
 0x4e2   : > { %v1071_v38 = vsub.f32 1.5, %v1070_v37 }
 0x4e3   : > { %v1838_v39 = vpop.eup %1837 }
 0x4e4   : > { %v1072_v40 = vmul.f32 %v1836_v33, %v1071_v38  ;;  %v1078_v41 = vmul.f32 %v1838_v39, %v1066_v34  ;;  %vm1084_vm13 = vweird.f32 %v1838_v39 }
 0x4e5   : > { %vm1085_vm0 = vmor %vm1083_vm15, %vm1084_vm13 }
 0x4e6   : > { %v1076_v43 = vsel %vm1075_vm12, %v1836_v33, %v1072_v40  ;;  %v1079_v44 = vmul.f32 %v1838_v39, %v1078_v41 }
 0x4e7   : > { %v1087_v46 = vmul.f32 %v1076_v43, %v1053_v20 }
 0x4e8   : > { %v1080_v47 = vmul.f32 0.5, %v1079_v44 }
 0x4e9   : > { %v1093_v48 = vmul.f32 %v1831_v42, %v1087_v46 }
 0x4ea   : > { %v1081_v49 = vsub.f32 1.5, %v1080_v47 }
 0x4eb   : > { %v1099_v50 = vadd.f32 %v1832_v45, %v1093_v48 }
 0x4ec   : > { %v1082_v51 = vmul.f32 %v1838_v39, %v1081_v49 }
 0x4ed   : > { %v1101_v52 = vpack.c.bf16 %v1099_v50, %v1099_v50 }
 0x4ee   : > { %v1086_v53 = vsel %vm1085_vm0, %v1838_v39, %v1082_v51 }
 0x4ef   : > { %1637 = vst.msk [vmem:[#allocation2 + $0x8] sm:$0xf] %vm1106_vm14, %v1101_v52  ;;  %v1088_v54 = vmul.f32 %v1086_v53, %v1054_v25 }
 0x4f1   : > { %v1094_v55 = vmul.f32 %v1831_v42, %v1088_v54 }
 0x4f3   : > { %v1100_v56 = vadd.f32 %v1832_v45, %v1094_v55 }
 0x4f5   : > { %v1102_v57 = vpack.c.bf16 %v1100_v56, %v1100_v56 }
 0x4f7   : > { %1638 = vst.msk [vmem:[#allocation2 + $0xc] sm:$0xf] %vm1106_vm14, %v1102_v57 }
 0x4f8 PF: > { %p1639_p8 = scmp.ne.s32.totalorder %s1896_s0, 2 }
 0x4f9   : > { %s2275_s5 = sld [smem:[#allocation14_spill]] (!%p1639_p8)  ;;  %s1909_s6 = smov (!%p1639_p8), 32  }
 0x4fa   : > { %1112 = sbr.rel (%p1639_p8) target bundleno = 2217 (0x8a9), region = 120  ;;  %s2276_s28 = sld [smem:[#allocation18_spill]] (!%p1639_p8) }
 0x4fb   : > { %s1910_s3 = smov (!%p1639_p8), 64  }
 0x4ff   : > { %v1754_v58 = vld [vmem:[#allocation2 + $0x8] sm:$0xff]  ;;  %v1755_v59 = vld [vmem:[%s2275_s5] sm:$0xff]  ;;  %vm1129_vm1 = vcmask 130048   ;;  %v1757_v60 = vld [vmem:[%s2247_s12 + $0x18] sm:$0xff]  ;;  %s1156_s0 = scalar_select %p732_p5, 1, 0 }
 0x500   : > { %1140 = vmatpush.bf16.msra.mxu0 %v1754_v58  ;;  %1194 = vmatpush.bf16.msra.mxu1 %v1757_v60  ;;  %v1756_v61 = vld [vmem:[%s2247_s12 + $0x10] sm:$0xff]  ;;  %v1783_v63 = vld [vmem:[#allocation2 + $0x8] sm:$0xff]   ;;  %vm1184_vm3 = vcmask 261120   ;;  %v1839_v7 = vld [vmem:[#allocation3 + $0x1] ss:$0 sm:$0xff]  ;;  %v1908_v16 = vmov 32.0  }
 0x501   : > { %v1157_v0 = vstv %s1156_s0  ;;  %v1781_v1 = vunpack.c.l.bf16 %v1783_v63  ;;  %v1782_v2 = vunpack.c.h.bf16 %v1783_v63  ;;  %1844 = vrcp.f32 %v1908_v16  ;;  %v1759_v36 = vld [vmem:[#allocation2 + $0x8] sm:$0xff]  ;;  %v1765_v46 = vld [vmem:[%s2276_s28 + $0x20] sm:$0xff]  ;;  %v1764_v53 = vld [vmem:[%s2276_s28 + $0x18] sm:$0xff] }
 0x502   : > { %vm1158_vm2 = vcmp.eq.s32.totalorder %v1157_v0, 1  ;;  %1295 = vrot.lane.b32.xlu2 %v1759_v36, %s1909_s6  ;;  %v1766_v44 = vld [vmem:[%s2276_s28 + $0x28] sm:$0xff]  ;;  %v1840_v50 = vld [vmem:[%s2250_s15 + $0x1] ss:$0 sm:$0xff]  ;;  %vm1274_vm9 = vcmask 257024   ;;  %vm1307_vm12 = vcmask 523264  }
 0x503   : > { %1648 = vmatmul.msk.bf16.vlgmr.msra.gmra.mxu0 %vm1129_vm1, %v1755_v59  ;;  %1367 = vmatpush.bf16.msra.mxu2 %v1766_v44  ;;  %v1841_v54 = vld [vmem:[%s2251_s16 + $0x1] ss:$0 sm:$0xff]  ;;  %v1763_v59 = vld [vmem:[%s2276_s28 + $0x10] sm:$0xff]  ;;  %vm1362_vm13 = vcmask 785408   ;;  %v1770_v16 = vld [vmem:[%s2255_s20 + $0x18] sm:$0xff] }
 0x504   : > { %1195 = vmatpush.bf16.msra.mxu1 %v1756_v61 }
 0x507   : > { %v1845_v17 = vpop.eup %1844  ;;  %1368 = vmatpush.bf16.msra.mxu2 %v1765_v46 }
 0x508   : > { %v1211_v18 = vmul.f32 32.0, %v1845_v17  ;;  %vm1215_vm4 = vweird.f32 %v1845_v17 }
 0x50a   : > { %v1212_v19 = vsub.f32 1.0, %v1211_v18  ;;  %v1768_v18 = vld [vmem:[%s2255_s20 + $0x8] sm:$0xff] }
 0x50b   : > { %1369 = vmatpush.bf16.msra.mxu2 %v1764_v53 }
 0x50c   : > { %v1213_v20 = vmul.f32 %v1845_v17, %v1212_v19  ;;  %v1767_v19 = vld [vmem:[%s2255_s20] sm:$0xff] }
 0x50e   : > { %v1214_v21 = vadd.f32 %v1845_v17, %v1213_v20 }
 0x50f   : > { %1370 = vmatpush.bf16.msra.mxu2 %v1763_v59 }
 0x510   : > { %v1216_v22 = vsel %vm1215_vm4, %v1845_v17, %v1214_v21  ;;  %v1769_v17 = vld [vmem:[%s2255_s20 + $0x10] sm:$0xff]  ;;  %v1842_v21 = vld [vmem:[#allocation4] ss:$0 sm:$0xff] }
 0x580   : > { %v1142_v62 = vpop.f32.mrf.mxu0 }
 0x581   : > { %v1159_v4 = vsel %vm1158_vm2, %v1142_v62, %v1781_v1 }
 0x588   : > { %v1144_v3 = vpop.f32.mrf.mxu0 }
 0x589   : > { %v1160_v5 = vsel %vm1158_vm2, %v1144_v3, %v1782_v2 }
 0x58a   : > { %v1161_v6 = vpack.c.bf16 %v1160_v5, %v1159_v4  ;;  %v1762_v5 = vld [vmem:[%s2276_s28 + $0x8] sm:$0xff] }
 0x58b   : > { %1371 = vmatpush.bf16.msra.mxu2 %v1762_v5 }
 0x58c   : > { %1663 = vmatmul.msk.bf16.vlgmr.msra.gmra.mxu1 %vm1184_vm3, %v1161_v6  ;;  %v1761_v6 = vld [vmem:[%s2276_s28] sm:$0xff] }
 0x58f   : > { %1372 = vmatpush.bf16.msra.mxu2 %v1761_v6 }
 0x609   : > { %v1197_v8 = vpop.f32.mrf.mxu1 }
 0x60a   : > { %v1198_v9 = vadd.f32 %v1839_v7, %v1197_v8  ;;  %v1773_v8 = vld [vmem:[%s2255_s20 + $0x30] sm:$0xff] }
 0x60c   : > { %v1202_v10 = vmax.f32 %v1198_v9, 0.0  ;;  %v1772_v9 = vld [vmem:[%s2255_s20 + $0x28] sm:$0xff] }
 0x60e   : > { %v1204_v11 = vsel %vm1184_vm3, %v1202_v10, 0.0 }
 0x60f   : > { %1205 = vadd.xlane.f32.xlu0 %v1204_v11  ;;  %v1296_v11 = vpop.permute.xlu2 %1295 }
 0x611   : > { %v1199_v12 = vpop.f32.mrf.mxu1 }
 0x612   : > { %v1200_v13 = vadd.f32 %v1839_v7, %v1199_v12  ;;  %v1774_v7 = vld [vmem:[%s2255_s20 + $0x38] sm:$0xff]  ;;  %v1758_v12 = vld [vmem:[#allocation2] sm:$0xff] }
 0x613   : > { %1450 = vmatpush.bf16.msra.mxu3 %v1774_v7 }
 0x614   : > { %v1203_v14 = vmax.f32 %v1200_v13, 0.0  ;;  %v1306_v13 = vsel %vm1184_vm3, %v1758_v12, %v1296_v11 }
 0x616   : > { %v1207_v15 = vsel %vm1184_vm3, %v1203_v14, 0.0 }
 0x617   : > { %1208 = vadd.xlane.f32.xlu0 %v1207_v15  ;;  %1451 = vmatpush.bf16.msra.mxu3 %v1773_v8 }
 0x61b   : > { %1452 = vmatpush.bf16.msra.mxu3 %v1772_v9 }
 0x682   : > { %v1206_v23 = vpop.xlane.xlu0 %1205 }
 0x683   : > { %v1217_v24 = vmul.f32 %v1216_v22, %v1206_v23 }
 0x685   : > { %v1219_v25 = vsub.f32 %v1202_v10, %v1217_v24  ;;  %v1771_v10 = vld [vmem:[%s2255_s20 + $0x20] sm:$0xff] }
 0x686   : > { %1453 = vmatpush.bf16.msra.mxu3 %v1771_v10 }
 0x687   : > { %v1221_v26 = vmul.f32 %v1219_v25, %v1219_v25 }
 0x689   : > { %v1223_v27 = vsel %vm1184_vm3, %v1221_v26, 0.0 }
 0x68a   : > { %1224 = vadd.xlane.f32.xlu1 %v1223_v27  ;;  %v1209_v28 = vpop.xlane.xlu0 %1208  ;;  %1454 = vmatpush.bf16.msra.mxu3 %v1770_v16 }
 0x68b   : > { %v1218_v29 = vmul.f32 %v1216_v22, %v1209_v28  ;;  %v1843_v28 = vld [vmem:[%s2256_s21] ss:$0 sm:$0xff] }
 0x68d   : > { %v1220_v30 = vsub.f32 %v1203_v14, %v1218_v29 }
 0x68e   : > { %1455 = vmatpush.bf16.msra.mxu3 %v1769_v17 }
 0x68f   : > { %v1222_v31 = vmul.f32 %v1220_v30, %v1220_v30 }
 0x691   : > { %v1226_v32 = vsel %vm1184_vm3, %v1222_v31, 0.0 }
 0x692   : > { %1227 = vadd.xlane.f32.xlu1 %v1226_v32  ;;  %1456 = vmatpush.bf16.msra.mxu3 %v1768_v18 }
 0x696   : > { %1457 = vmatpush.bf16.msra.mxu3 %v1767_v19 }
 0x6fd   : > { %v1225_v33 = vpop.xlane.xlu1 %1224 }
 0x6fe   : > { %v1229_v34 = vmul.f32 %v1225_v33, %v1216_v22 }
 0x700   : > { %v1231_v35 = vadd.f32 1e-05, %v1229_v34 }
 0x702   : > { %1846 = vrsqrt.f32 %v1231_v35  ;;  %vm1239_vm6 = vweird.f32 %v1231_v35 }
 0x705   : > { %v1228_v37 = vpop.xlane.xlu1 %1227 }
 0x706   : > { %v1230_v38 = vmul.f32 %v1228_v37, %v1216_v22 }
 0x708   : > { %v1847_v39 = vpop.eup %1846  ;;  %v1232_v40 = vadd.f32 1e-05, %v1230_v38 }
 0x709   : > { %v1234_v41 = vmul.f32 %v1847_v39, %v1231_v35  ;;  %vm1240_vm5 = vweird.f32 %v1847_v39 }
 0x70a   : > { %1848 = vrsqrt.f32 %v1232_v40  ;;  %vm1241_vm7 = vmor %vm1239_vm6, %vm1240_vm5  ;;  %vm1249_vm10 = vweird.f32 %v1232_v40 }
 0x70b   : > { %v1235_v42 = vmul.f32 %v1847_v39, %v1234_v41 }
 0x70d   : > { %v1236_v43 = vmul.f32 0.5, %v1235_v42 }
 0x70f   : > { %v1237_v45 = vsub.f32 1.5, %v1236_v43 }
 0x710   : > { %v1849_v47 = vpop.eup %1848 }
 0x711   : > { %v1238_v48 = vmul.f32 %v1847_v39, %v1237_v45  ;;  %v1244_v49 = vmul.f32 %v1849_v47, %v1232_v40  ;;  %vm1250_vm8 = vweird.f32 %v1849_v47 }
 0x712   : > { %vm1251_vm11 = vmor %vm1249_vm10, %vm1250_vm8 }
 0x713   : > { %v1242_v51 = vsel %vm1241_vm7, %v1847_v39, %v1238_v48  ;;  %v1245_v52 = vmul.f32 %v1849_v47, %v1244_v49 }
 0x714   : > { %v1253_v55 = vmul.f32 %v1242_v51, %v1219_v25 }
 0x715   : > { %v1246_v56 = vmul.f32 0.5, %v1245_v52 }
 0x716   : > { %v1260_v57 = vmul.f32 %v1840_v50, %v1253_v55 }
 0x717   : > { %v1247_v58 = vsub.f32 1.5, %v1246_v56 }
 0x718   : > { %v1267_v60 = vadd.f32 %v1841_v54, %v1260_v57 }
 0x719   : > { %v1248_v61 = vmul.f32 %v1849_v47, %v1247_v58 }
 0x71a   : > { %v1269_v62 = vpack.c.bf16 %v1267_v60, %v1267_v60 }
 0x71b   : > { %v1252_v63 = vsel %vm1251_vm11, %v1849_v47, %v1248_v61 }
 0x71c   : > { %1666 = vst.msk [vmem:[#allocation2 + $0x10] sm:$0xf] %vm1274_vm9, %v1269_v62  ;;  %v1254_v0 = vmul.f32 %v1252_v63, %v1220_v30 }
 0x71e   : > { %v1261_v1 = vmul.f32 %v1840_v50, %v1254_v0 }
 0x720   : > { %v1268_v2 = vadd.f32 %v1841_v54, %v1261_v1 }
 0x722   : > { %v1270_v3 = vpack.c.bf16 %v1268_v2, %v1268_v2 }
 0x724   : > { %1667 = vst.msk [vmem:[#allocation2 + $0x14] sm:$0xf] %vm1274_vm9, %v1270_v3 }
 0x72b   : > { %v1760_v4 = vld [vmem:[#allocation2 + $0x10] sm:$0xff] }
 0x72c   : > { %1302 = vrot.lane.b32.xlu2 %v1760_v4, %s1910_s3 }
 0x786   : > { %v1303_v14 = vpop.permute.xlu2 %1302 }
 0x787   : > { %v1309_v15 = vsel %vm1307_vm12, %v1306_v13, %v1303_v14 }
 0x788   : > { %1708 = vmatmul.msk.bf16.vlgmr.msra.gmra.mxu2 %vm1362_vm13, %v1309_v15 }
 0x80b   : > { %v1374_v20 = vpop.f32.mrf.mxu2 }
 0x80c   : > { %v1375_v22 = vadd.f32 %v1842_v21, %v1374_v20 }
 0x80e   : > { %v1379_v25 = vmax.f32 %v1375_v22, 0.0 }
 0x813   : > { %v1376_v23 = vpop.f32.mrf.mxu2 }
 0x814   : > { %v1377_v24 = vadd.f32 %v1842_v21, %v1376_v23 }
 0x816   : > { %v1380_v26 = vmax.f32 %v1377_v24, 0.0 }
 0x818   : > { %v1381_v27 = vpack.c.bf16 %v1380_v26, %v1379_v25 }
 0x81a   : > { %1458 = vmatmul.bf16.vlgmr.msra.gmra.mxu3 %v1381_v27 }
 0x89d   : > { %v1459_v29 = vpop.f32.mrf.mxu3 }
 0x89e   : > { %v1460_v30 = vadd.f32 %v1843_v28, %v1459_v29 }
 0x8a0   : > { %1464 = vst [vmem:[#allocation8] sm:$0xff] %v1460_v30 }
 0x8a5   : > { %v1461_v31 = vpop.f32.mrf.mxu3 }
 0x8a6   : > { %v1462_v32 = vadd.f32 %v1843_v28, %v1461_v31 }
 0x8a8   : > { %1465 = vst [vmem:[#allocation8 + $0x8] sm:$0xff] %v1462_v32 }
 0x8a9 PF: > { %s2277_s29 = sadd.s32 4294967295, %s1904_s1   ;;  %s1485_s30 = sshll.u32 %s2257_s22, 4  ;;  %s1486_s30 = int_to_ptr.hbm [resolvable:$true] %s1485_s30 }
 0x8aa   : > { %p1792_p9 = scmp.eq.s32.totalorder %s2277_s29, 2  ;;  %s1911_s4 = smov [#allocation8]  }
 0x8ab   : > { %s1483_s25 = sshll.u32 %s1911_s4, 4  ;;  %s1912_s26 = smov 128   ;;  %s1484_s25 = int_to_ptr.vmem [resolvable:$true] %s1483_s25 }
 0x8ac   : > { %s1913_s0 = smov 8  }
 0x8ad   : > { %1785 = dma.vmem_to_hbm [thread:$0]  (%p1792_p9), %s1484_s25, 256, %s1486_s30, [#allocation9], %s1912_s26, %s1912_s26, %s1913_s0  }
 0x8ae PF: > { %p1793_p10 = scmp.ge.s32.totalorder %s1904_s1, 2  ;;  %s2278_s6 = sadd.s32 4294967294, %s1904_s1  }
 0x8af   : > { %p1794_p11 = scmp.eq.s32.totalorder %s2278_s6, 2 }
 0x8b1   : > { %p1789_p12 = pnand %p1794_p11, %p1793_p10 }
 0x8b3   : > { %p1790_p13 = pneg %p1789_p12 }
 0x8b5   : > { %1891 = dma.done.wait (%p1790_p13), [#allocation9], 256  }
 0x8b6   : > { %1893 = vsyncadd (%p1790_p13), [#allocation9], 4294967040  ;;  %s38_s1 = sadd.s32 1, %s1904_s1   ;;  %s2279_s0 = smov %s1900_s23 }
 0x8b7   : > { %p35_p0 = scmp.ge.s32.totalorder %s38_s1, 5   ;;  %s2280_s23 = smov %s2282_s24 }
 0x8b9   :  { %37 = sbr.rel (!%p35_p0) target bundleno = 21 (0x15), region = 172 }
 0x8be   :  { %1507 = vsyncpa [#allocation9], 1 }
 0x8bf   :  { %1509 = vsyncpa [#allocation9 + $0x1], 1 }

</bundles_post_ra>
